<compile_context>
chip_gen: v7x
topology: tpu7x:2x2x1
jax: 0.10.0
libtpu: 0.0.40
codegen_flags: <defaults>
</compile_context>

<pallas_src>
import jax
import jax.numpy as jnp
from jax.experimental import pallas as pl
from jax.experimental.pallas import tpu as pltpu


# TODO(synk): VA_SUBNET class definition is not provided in the source file;
# it is treated as identity here (view-adaptation transform not reproduced).


def _valstm_kernel(x_ref, fn_ref,
                   wih1, whh1, b1,
                   wih2, whh2, b2,
                   wih3, whh3, b3,
                   wfc, bfc,
                   out_ref,
                   seq_scr):
    """Whole forward pass in one kernel invocation (no time grid).

    x_ref:   (T*B, D) time-major-flattened input, resident in VMEM.
    fn_ref:  (B, 1) float32 frame counts.
    seq_scr: (T*B, H) VMEM scratch holding one layer's full hidden sequence.
    """
    f32 = jnp.float32
    B = fn_ref.shape[0]
    TB = x_ref.shape[0]
    T = TB // B
    H = whh1.shape[0]

    def input_proj(seq_in, wih_ref, b_ref):
        # One (T*B, D_in) @ (D_in, 4H) matmul for all timesteps at once
        # (far better MXU fill than T tiny M=B pushes).
        return jnp.dot(seq_in, wih_ref[...],
                       preferred_element_type=f32) + b_ref[...]

    def recurrence(pre, whh_ref):
        # Only the h @ Whh matmul stays on the serial per-step path.
        h = jnp.zeros((B, H), f32)
        c = jnp.zeros((B, H), f32)
        hs = []
        for t in range(T):            # static unroll: scheduler sees all steps
            g = pre[t * B:(t + 1) * B, :] + jnp.dot(
                h, whh_ref[...], preferred_element_type=f32)
            # One sigmoid + one tanh over the full (B, 4H) gate block, then
            # slice gate windows (instead of 4 separate sub-vreg EUP pushes).
            sg = jax.nn.sigmoid(g)
            th = jnp.tanh(g)
            i = sg[:, 0:H]
            f = sg[:, H:2 * H]
            gg = th[:, 2 * H:3 * H]
            o = sg[:, 3 * H:4 * H]
            c = f * c + i * gg
            h = o * jnp.tanh(c)
            hs.append(h)
        return hs

    def store_seq(hs):
        for t in range(T):
            seq_scr[pl.ds(t * B, B), :] = hs[t]

    # ---- Layer 1: x -> hidden sequence (stored in scratch) ----
    store_seq(recurrence(input_proj(x_ref[...], wih1, b1), whh1))

    # ---- Layer 2: pre-projection reads the scratch before it is overwritten
    pre2 = input_proj(seq_scr[...], wih2, b2)
    store_seq(recurrence(pre2, whh2))

    # ---- Layer 3: accumulate the frame-masked time-sum of hidden states ----
    fn = fn_ref[...]                                     # (B, 1)
    pre3 = input_proj(seq_scr[...], wih3, b3)
    hs3 = recurrence(pre3, whh3)
    acc_h = jnp.zeros((B, H), f32)
    for t in range(T):
        mask = (f32(t) < fn).astype(f32)                 # keep t < frame_num
        acc_h = acc_h + mask * hs3[t]

    # ---- Hoisted TimeDistributed Linear + frame normalization ----
    # sum_t m_t (h_t @ Wfc + bfc) == (sum_t m_t h_t) @ Wfc + bfc * sum_t m_t
    n_valid = jnp.minimum(fn, f32(T))                    # == sum_t mask_t
    logits = jnp.dot(acc_h, wfc[...],
                     preferred_element_type=f32) + bfc[...] * n_valid
    out_ref[...] = logits * pl.reciprocal(fn + f32(0.01), approx=True)


def valstm_forward(x, frame_num, params):
    """x: (B, T, D) float32; frame_num: (B,) int32; returns (B, num_classes)."""
    B, T, D = x.shape
    H = params["hidden"]
    C = params["num_classes"]

    # Time-major flatten so each timestep's batch rows are contiguous in-kernel.
    x2d = jnp.transpose(x, (1, 0, 2)).reshape(T * B, D).astype(jnp.float32)
    fn = frame_num.reshape(B, 1).astype(jnp.float32)

    weights = [params["wih1"], params["whh1"], params["b1"],
               params["wih2"], params["whh2"], params["b2"],
               params["wih3"], params["whh3"], params["b3"],
               params["wfc"], params["bfc"]]

    # No grid: all inputs/weights are DMA'd into VMEM once and stay resident
    # for the single invocation (no per-step grid overhead, no weight
    # double-buffering).
    return pl.pallas_call(
        _valstm_kernel,
        out_shape=jax.ShapeDtypeStruct((B, C), jnp.float32),
        scratch_shapes=[pltpu.VMEM((T * B, H), jnp.float32)],
    )(x2d, fn, *weights)


# ---------------- pure-JAX reference (for correctness check) ----------------

def _lstm_layer_ref(x, wih, whh, b):
    B, T, _ = x.shape
    H = whh.shape[0]

    def step(carry, xt):
        h, c = carry
        g = xt @ wih + h @ whh + b
        i = jax.nn.sigmoid(g[:, :H])
        f = jax.nn.sigmoid(g[:, H:2 * H])
        gg = jnp.tanh(g[:, 2 * H:3 * H])
        o = jax.nn.sigmoid(g[:, 3 * H:])
        c = f * c + i * gg
        h = o * jnp.tanh(c)
        return (h, c), h

    init = (jnp.zeros((B, H), jnp.float32), jnp.zeros((B, H), jnp.float32))
    _, ys = jax.lax.scan(step, init, jnp.transpose(x, (1, 0, 2)))
    return jnp.transpose(ys, (1, 0, 2))


def valstm_reference(x, frame_num, params):
    B, T, _ = x.shape
    y = x.astype(jnp.float32)
    for layer in range(3):
        y = _lstm_layer_ref(y, params[f"wih{layer + 1}"],
                            params[f"whh{layer + 1}"], params[f"b{layer + 1}"])
    logits = y @ params["wfc"] + params["bfc"]                    # (B, T, C)
    idx = jnp.arange(T)[None, :]                                  # (1, T)
    mask = (idx < frame_num[:, None]).astype(jnp.float32)[:, :, None]
    s = jnp.sum(logits * mask, axis=1)
    return s / (frame_num[:, None].astype(jnp.float32) + 0.01)


# -------------------------------- setup -------------------------------------

def make_params(key, input_size, hidden, num_classes):
    """PyTorch-style LSTM/Linear init: U(-1/sqrt(H), 1/sqrt(H)). Deterministic."""
    params = {"hidden": hidden, "num_classes": num_classes}
    k = 1.0 / jnp.sqrt(jnp.float32(hidden))
    keys = jax.random.split(key, 16)
    d_in = input_size
    ki = 0
    for layer in range(1, 4):
        params[f"wih{layer}"] = jax.random.uniform(
            keys[ki], (d_in, 4 * hidden), jnp.float32, -k, k); ki += 1
        params[f"whh{layer}"] = jax.random.uniform(
            keys[ki], (hidden, 4 * hidden), jnp.float32, -k, k); ki += 1
        b_ih = jax.random.uniform(keys[ki], (4 * hidden,), jnp.float32, -k, k); ki += 1
        b_hh = jax.random.uniform(keys[ki], (4 * hidden,), jnp.float32, -k, k); ki += 1
        params[f"b{layer}"] = (b_ih + b_hh).reshape(1, 4 * hidden)
        d_in = hidden
    kf = 1.0 / jnp.sqrt(jnp.float32(hidden))
    params["wfc"] = jax.random.uniform(
        keys[ki], (hidden, num_classes), jnp.float32, -kf, kf); ki += 1
    params["bfc"] = jax.random.uniform(
        keys[ki], (num_classes,), jnp.float32, -kf, kf).reshape(1, num_classes)
    return params


if __name__ == "__main__":
    B, T, D = 2, 8, 24          # batch, time_step, input_size
    H, C = 32, 8                # hidden, num_classes

    root = jax.random.PRNGKey(0)
    kx, kp = jax.random.split(root)
    x = jax.random.normal(kx, (B, T, D), jnp.float32)
    frame_num = jnp.array([5, 8], dtype=jnp.int32)          # (batch,)
    params = make_params(kp, D, H, C)

    out = valstm_forward(x, frame_num, params)
    out = jax.block_until_ready(out)

    ref = valstm_reference(x, frame_num, params)
    assert out.shape == (B, C)
    assert jnp.allclose(out, ref, rtol=1e-3, atol=1e-3), (out, ref)

    print("KERNEL_OK")
</pallas_src>

<mosaic_0001>
module attributes {stable_mosaic.version = 11 : i64} {
  func.func @_valstm_kernel(%arg0: memref<16x24xf32, #tpu.memory_space<vmem>>, %arg1: memref<2x1xf32, #tpu.memory_space<vmem>>, %arg2: memref<24x128xf32, #tpu.memory_space<vmem>>, %arg3: memref<32x128xf32, #tpu.memory_space<vmem>>, %arg4: memref<1x128xf32, #tpu.memory_space<vmem>>, %arg5: memref<32x128xf32, #tpu.memory_space<vmem>>, %arg6: memref<32x128xf32, #tpu.memory_space<vmem>>, %arg7: memref<1x128xf32, #tpu.memory_space<vmem>>, %arg8: memref<32x128xf32, #tpu.memory_space<vmem>>, %arg9: memref<32x128xf32, #tpu.memory_space<vmem>>, %arg10: memref<1x128xf32, #tpu.memory_space<vmem>>, %arg11: memref<32x8xf32, #tpu.memory_space<vmem>>, %arg12: memref<1x8xf32, #tpu.memory_space<vmem>>, %arg13: memref<2x8xf32, #tpu.memory_space<vmem>>, %arg14: memref<16x32xf32, #tpu.memory_space<vmem>>) attributes {dimension_semantics = [], scalar_prefetch = 0 : i64, scratch_operands = 1 : i64, tpu.core_type = #tpu.core_type<tc>} {
    %c0 = arith.constant 0 : index
    %c0_0 = arith.constant 0 : index
    %0 = vector.load %arg0[%c0, %c0_0] : memref<16x24xf32, #tpu.memory_space<vmem>>, vector<16x24xf32>
    %c0_1 = arith.constant 0 : index
    %c0_2 = arith.constant 0 : index
    %1 = vector.load %arg2[%c0_1, %c0_2] : memref<24x128xf32, #tpu.memory_space<vmem>>, vector<24x128xf32>
    %cst = arith.constant dense<0.000000e+00> : vector<16x128xf32>
    %2 = tpu.matmul %0, %1, %cst {dimension_numbers = #tpu.dot_dimension_numbers<[1], [0], [0], [1], [0, 0, 1, 1], [], []>} : vector<16x24xf32>, vector<24x128xf32>, vector<16x128xf32> -> vector<16x128xf32>
    %c0_3 = arith.constant 0 : index
    %c0_4 = arith.constant 0 : index
    %3 = vector.load %arg4[%c0_3, %c0_4] : memref<1x128xf32, #tpu.memory_space<vmem>>, vector<1x128xf32>
    %4 = vector.broadcast %3 : vector<1x128xf32> to vector<16x128xf32>
    %5 = arith.addf %2, %4 : vector<16x128xf32>
    %cst_5 = arith.constant 0.000000e+00 : f32
    %6 = vector.broadcast %cst_5 : f32 to vector<2x32xf32>
    %cst_6 = arith.constant 0.000000e+00 : f32
    %7 = vector.broadcast %cst_6 : f32 to vector<2x32xf32>
    %8 = vector.extract_strided_slice %5 {offsets = [0, 0], sizes = [2, 128], strides = [1, 1]} : vector<16x128xf32> to vector<2x128xf32>
    %c0_7 = arith.constant 0 : index
    %c0_8 = arith.constant 0 : index
    %9 = vector.load %arg3[%c0_7, %c0_8] : memref<32x128xf32, #tpu.memory_space<vmem>>, vector<32x128xf32>
    %cst_9 = arith.constant dense<0.000000e+00> : vector<2x128xf32>
    %10 = tpu.matmul %6, %9, %cst_9 {dimension_numbers = #tpu.dot_dimension_numbers<[1], [0], [0], [1], [0, 0, 1, 1], [], []>} : vector<2x32xf32>, vector<32x128xf32>, vector<2x128xf32> -> vector<2x128xf32>
    %11 = arith.addf %8, %10 : vector<2x128xf32>
    %12 = arith.negf %11 : vector<2x128xf32>
    %13 = math.exp %12 : vector<2x128xf32>
    %cst_10 = arith.constant 1.000000e+00 : f32
    %14 = vector.broadcast %cst_10 : f32 to vector<2x128xf32>
    %15 = arith.addf %14, %13 : vector<2x128xf32>
    %16 = arith.divf %14, %15 : vector<2x128xf32>
    %17 = math.tanh %11 : vector<2x128xf32>
    %18 = vector.extract_strided_slice %16 {offsets = [0, 0], sizes = [2, 32], strides = [1, 1]} : vector<2x128xf32> to vector<2x32xf32>
    %19 = vector.extract_strided_slice %16 {offsets = [0, 32], sizes = [2, 32], strides = [1, 1]} : vector<2x128xf32> to vector<2x32xf32>
    %20 = vector.extract_strided_slice %17 {offsets = [0, 64], sizes = [2, 32], strides = [1, 1]} : vector<2x128xf32> to vector<2x32xf32>
    %21 = vector.extract_strided_slice %16 {offsets = [0, 96], sizes = [2, 32], strides = [1, 1]} : vector<2x128xf32> to vector<2x32xf32>
    %22 = arith.mulf %19, %7 : vector<2x32xf32>
    %23 = arith.mulf %18, %20 : vector<2x32xf32>
    %24 = arith.addf %22, %23 : vector<2x32xf32>
    %25 = math.tanh %24 : vector<2x32xf32>
    %26 = arith.mulf %21, %25 : vector<2x32xf32>
    %27 = vector.extract_strided_slice %5 {offsets = [2, 0], sizes = [2, 128], strides = [1, 1]} : vector<16x128xf32> to vector<2x128xf32>
    %c0_11 = arith.constant 0 : index
    %c0_12 = arith.constant 0 : index
    %28 = vector.load %arg3[%c0_11, %c0_12] : memref<32x128xf32, #tpu.memory_space<vmem>>, vector<32x128xf32>
    %cst_13 = arith.constant dense<0.000000e+00> : vector<2x128xf32>
    %29 = tpu.matmul %26, %28, %cst_13 {dimension_numbers = #tpu.dot_dimension_numbers<[1], [0], [0], [1], [0, 0, 1, 1], [], []>} : vector<2x32xf32>, vector<32x128xf32>, vector<2x128xf32> -> vector<2x128xf32>
    %30 = arith.addf %27, %29 : vector<2x128xf32>
    %31 = arith.negf %30 : vector<2x128xf32>
    %32 = math.exp %31 : vector<2x128xf32>
    %cst_14 = arith.constant 1.000000e+00 : f32
    %33 = vector.broadcast %cst_14 : f32 to vector<2x128xf32>
    %34 = arith.addf %33, %32 : vector<2x128xf32>
    %35 = arith.divf %33, %34 : vector<2x128xf32>
    %36 = math.tanh %30 : vector<2x128xf32>
    %37 = vector.extract_strided_slice %35 {offsets = [0, 0], sizes = [2, 32], strides = [1, 1]} : vector<2x128xf32> to vector<2x32xf32>
    %38 = vector.extract_strided_slice %35 {offsets = [0, 32], sizes = [2, 32], strides = [1, 1]} : vector<2x128xf32> to vector<2x32xf32>
    %39 = vector.extract_strided_slice %36 {offsets = [0, 64], sizes = [2, 32], strides = [1, 1]} : vector<2x128xf32> to vector<2x32xf32>
    %40 = vector.extract_strided_slice %35 {offsets = [0, 96], sizes = [2, 32], strides = [1, 1]} : vector<2x128xf32> to vector<2x32xf32>
    %41 = arith.mulf %38, %24 : vector<2x32xf32>
    %42 = arith.mulf %37, %39 : vector<2x32xf32>
    %43 = arith.addf %41, %42 : vector<2x32xf32>
    %44 = math.tanh %43 : vector<2x32xf32>
    %45 = arith.mulf %40, %44 : vector<2x32xf32>
    %46 = vector.extract_strided_slice %5 {offsets = [4, 0], sizes = [2, 128], strides = [1, 1]} : vector<16x128xf32> to vector<2x128xf32>
    %c0_15 = arith.constant 0 : index
    %c0_16 = arith.constant 0 : index
    %47 = vector.load %arg3[%c0_15, %c0_16] : memref<32x128xf32, #tpu.memory_space<vmem>>, vector<32x128xf32>
    %cst_17 = arith.constant dense<0.000000e+00> : vector<2x128xf32>
    %48 = tpu.matmul %45, %47, %cst_17 {dimension_numbers = #tpu.dot_dimension_numbers<[1], [0], [0], [1], [0, 0, 1, 1], [], []>} : vector<2x32xf32>, vector<32x128xf32>, vector<2x128xf32> -> vector<2x128xf32>
    %49 = arith.addf %46, %48 : vector<2x128xf32>
    %50 = arith.negf %49 : vector<2x128xf32>
    %51 = math.exp %50 : vector<2x128xf32>
    %cst_18 = arith.constant 1.000000e+00 : f32
    %52 = vector.broadcast %cst_18 : f32 to vector<2x128xf32>
    %53 = arith.addf %52, %51 : vector<2x128xf32>
    %54 = arith.divf %52, %53 : vector<2x128xf32>
    %55 = math.tanh %49 : vector<2x128xf32>
    %56 = vector.extract_strided_slice %54 {offsets = [0, 0], sizes = [2, 32], strides = [1, 1]} : vector<2x128xf32> to vector<2x32xf32>
    %57 = vector.extract_strided_slice %54 {offsets = [0, 32], sizes = [2, 32], strides = [1, 1]} : vector<2x128xf32> to vector<2x32xf32>
    %58 = vector.extract_strided_slice %55 {offsets = [0, 64], sizes = [2, 32], strides = [1, 1]} : vector<2x128xf32> to vector<2x32xf32>
    %59 = vector.extract_strided_slice %54 {offsets = [0, 96], sizes = [2, 32], strides = [1, 1]} : vector<2x128xf32> to vector<2x32xf32>
    %60 = arith.mulf %57, %43 : vector<2x32xf32>
    %61 = arith.mulf %56, %58 : vector<2x32xf32>
    %62 = arith.addf %60, %61 : vector<2x32xf32>
    %63 = math.tanh %62 : vector<2x32xf32>
    %64 = arith.mulf %59, %63 : vector<2x32xf32>
    %65 = vector.extract_strided_slice %5 {offsets = [6, 0], sizes = [2, 128], strides = [1, 1]} : vector<16x128xf32> to vector<2x128xf32>
    %c0_19 = arith.constant 0 : index
    %c0_20 = arith.constant 0 : index
    %66 = vector.load %arg3[%c0_19, %c0_20] : memref<32x128xf32, #tpu.memory_space<vmem>>, vector<32x128xf32>
    %cst_21 = arith.constant dense<0.000000e+00> : vector<2x128xf32>
    %67 = tpu.matmul %64, %66, %cst_21 {dimension_numbers = #tpu.dot_dimension_numbers<[1], [0], [0], [1], [0, 0, 1, 1], [], []>} : vector<2x32xf32>, vector<32x128xf32>, vector<2x128xf32> -> vector<2x128xf32>
    %68 = arith.addf %65, %67 : vector<2x128xf32>
    %69 = arith.negf %68 : vector<2x128xf32>
    %70 = math.exp %69 : vector<2x128xf32>
    %cst_22 = arith.constant 1.000000e+00 : f32
    %71 = vector.broadcast %cst_22 : f32 to vector<2x128xf32>
    %72 = arith.addf %71, %70 : vector<2x128xf32>
    %73 = arith.divf %71, %72 : vector<2x128xf32>
    %74 = math.tanh %68 : vector<2x128xf32>
    %75 = vector.extract_strided_slice %73 {offsets = [0, 0], sizes = [2, 32], strides = [1, 1]} : vector<2x128xf32> to vector<2x32xf32>
    %76 = vector.extract_strided_slice %73 {offsets = [0, 32], sizes = [2, 32], strides = [1, 1]} : vector<2x128xf32> to vector<2x32xf32>
    %77 = vector.extract_strided_slice %74 {offsets = [0, 64], sizes = [2, 32], strides = [1, 1]} : vector<2x128xf32> to vector<2x32xf32>
    %78 = vector.extract_strided_slice %73 {offsets = [0, 96], sizes = [2, 32], strides = [1, 1]} : vector<2x128xf32> to vector<2x32xf32>
    %79 = arith.mulf %76, %62 : vector<2x32xf32>
    %80 = arith.mulf %75, %77 : vector<2x32xf32>
    %81 = arith.addf %79, %80 : vector<2x32xf32>
    %82 = math.tanh %81 : vector<2x32xf32>
    %83 = arith.mulf %78, %82 : vector<2x32xf32>
    %84 = vector.extract_strided_slice %5 {offsets = [8, 0], sizes = [2, 128], strides = [1, 1]} : vector<16x128xf32> to vector<2x128xf32>
    %c0_23 = arith.constant 0 : index
    %c0_24 = arith.constant 0 : index
    %85 = vector.load %arg3[%c0_23, %c0_24] : memref<32x128xf32, #tpu.memory_space<vmem>>, vector<32x128xf32>
    %cst_25 = arith.constant dense<0.000000e+00> : vector<2x128xf32>
    %86 = tpu.matmul %83, %85, %cst_25 {dimension_numbers = #tpu.dot_dimension_numbers<[1], [0], [0], [1], [0, 0, 1, 1], [], []>} : vector<2x32xf32>, vector<32x128xf32>, vector<2x128xf32> -> vector<2x128xf32>
    %87 = arith.addf %84, %86 : vector<2x128xf32>
    %88 = arith.negf %87 : vector<2x128xf32>
    %89 = math.exp %88 : vector<2x128xf32>
    %cst_26 = arith.constant 1.000000e+00 : f32
    %90 = vector.broadcast %cst_26 : f32 to vector<2x128xf32>
    %91 = arith.addf %90, %89 : vector<2x128xf32>
    %92 = arith.divf %90, %91 : vector<2x128xf32>
    %93 = math.tanh %87 : vector<2x128xf32>
    %94 = vector.extract_strided_slice %92 {offsets = [0, 0], sizes = [2, 32], strides = [1, 1]} : vector<2x128xf32> to vector<2x32xf32>
    %95 = vector.extract_strided_slice %92 {offsets = [0, 32], sizes = [2, 32], strides = [1, 1]} : vector<2x128xf32> to vector<2x32xf32>
    %96 = vector.extract_strided_slice %93 {offsets = [0, 64], sizes = [2, 32], strides = [1, 1]} : vector<2x128xf32> to vector<2x32xf32>
    %97 = vector.extract_strided_slice %92 {offsets = [0, 96], sizes = [2, 32], strides = [1, 1]} : vector<2x128xf32> to vector<2x32xf32>
    %98 = arith.mulf %95, %81 : vector<2x32xf32>
    %99 = arith.mulf %94, %96 : vector<2x32xf32>
    %100 = arith.addf %98, %99 : vector<2x32xf32>
    %101 = math.tanh %100 : vector<2x32xf32>
    %102 = arith.mulf %97, %101 : vector<2x32xf32>
    %103 = vector.extract_strided_slice %5 {offsets = [10, 0], sizes = [2, 128], strides = [1, 1]} : vector<16x128xf32> to vector<2x128xf32>
    %c0_27 = arith.constant 0 : index
    %c0_28 = arith.constant 0 : index
    %104 = vector.load %arg3[%c0_27, %c0_28] : memref<32x128xf32, #tpu.memory_space<vmem>>, vector<32x128xf32>
    %cst_29 = arith.constant dense<0.000000e+00> : vector<2x128xf32>
    %105 = tpu.matmul %102, %104, %cst_29 {dimension_numbers = #tpu.dot_dimension_numbers<[1], [0], [0], [1], [0, 0, 1, 1], [], []>} : vector<2x32xf32>, vector<32x128xf32>, vector<2x128xf32> -> vector<2x128xf32>
    %106 = arith.addf %103, %105 : vector<2x128xf32>
    %107 = arith.negf %106 : vector<2x128xf32>
    %108 = math.exp %107 : vector<2x128xf32>
    %cst_30 = arith.constant 1.000000e+00 : f32
    %109 = vector.broadcast %cst_30 : f32 to vector<2x128xf32>
    %110 = arith.addf %109, %108 : vector<2x128xf32>
    %111 = arith.divf %109, %110 : vector<2x128xf32>
    %112 = math.tanh %106 : vector<2x128xf32>
    %113 = vector.extract_strided_slice %111 {offsets = [0, 0], sizes = [2, 32], strides = [1, 1]} : vector<2x128xf32> to vector<2x32xf32>
    %114 = vector.extract_strided_slice %111 {offsets = [0, 32], sizes = [2, 32], strides = [1, 1]} : vector<2x128xf32> to vector<2x32xf32>
    %115 = vector.extract_strided_slice %112 {offsets = [0, 64], sizes = [2, 32], strides = [1, 1]} : vector<2x128xf32> to vector<2x32xf32>
    %116 = vector.extract_strided_slice %111 {offsets = [0, 96], sizes = [2, 32], strides = [1, 1]} : vector<2x128xf32> to vector<2x32xf32>
    %117 = arith.mulf %114, %100 : vector<2x32xf32>
    %118 = arith.mulf %113, %115 : vector<2x32xf32>
    %119 = arith.addf %117, %118 : vector<2x32xf32>
    %120 = math.tanh %119 : vector<2x32xf32>
    %121 = arith.mulf %116, %120 : vector<2x32xf32>
    %122 = vector.extract_strided_slice %5 {offsets = [12, 0], sizes = [2, 128], strides = [1, 1]} : vector<16x128xf32> to vector<2x128xf32>
    %c0_31 = arith.constant 0 : index
    %c0_32 = arith.constant 0 : index
    %123 = vector.load %arg3[%c0_31, %c0_32] : memref<32x128xf32, #tpu.memory_space<vmem>>, vector<32x128xf32>
    %cst_33 = arith.constant dense<0.000000e+00> : vector<2x128xf32>
    %124 = tpu.matmul %121, %123, %cst_33 {dimension_numbers = #tpu.dot_dimension_numbers<[1], [0], [0], [1], [0, 0, 1, 1], [], []>} : vector<2x32xf32>, vector<32x128xf32>, vector<2x128xf32> -> vector<2x128xf32>
    %125 = arith.addf %122, %124 : vector<2x128xf32>
    %126 = arith.negf %125 : vector<2x128xf32>
    %127 = math.exp %126 : vector<2x128xf32>
    %cst_34 = arith.constant 1.000000e+00 : f32
    %128 = vector.broadcast %cst_34 : f32 to vector<2x128xf32>
    %129 = arith.addf %128, %127 : vector<2x128xf32>
    %130 = arith.divf %128, %129 : vector<2x128xf32>
    %131 = math.tanh %125 : vector<2x128xf32>
    %132 = vector.extract_strided_slice %130 {offsets = [0, 0], sizes = [2, 32], strides = [1, 1]} : vector<2x128xf32> to vector<2x32xf32>
    %133 = vector.extract_strided_slice %130 {offsets = [0, 32], sizes = [2, 32], strides = [1, 1]} : vector<2x128xf32> to vector<2x32xf32>
    %134 = vector.extract_strided_slice %131 {offsets = [0, 64], sizes = [2, 32], strides = [1, 1]} : vector<2x128xf32> to vector<2x32xf32>
    %135 = vector.extract_strided_slice %130 {offsets = [0, 96], sizes = [2, 32], strides = [1, 1]} : vector<2x128xf32> to vector<2x32xf32>
    %136 = arith.mulf %133, %119 : vector<2x32xf32>
    %137 = arith.mulf %132, %134 : vector<2x32xf32>
    %138 = arith.addf %136, %137 : vector<2x32xf32>
    %139 = math.tanh %138 : vector<2x32xf32>
    %140 = arith.mulf %135, %139 : vector<2x32xf32>
    %141 = vector.extract_strided_slice %5 {offsets = [14, 0], sizes = [2, 128], strides = [1, 1]} : vector<16x128xf32> to vector<2x128xf32>
    %c0_35 = arith.constant 0 : index
    %c0_36 = arith.constant 0 : index
    %142 = vector.load %arg3[%c0_35, %c0_36] : memref<32x128xf32, #tpu.memory_space<vmem>>, vector<32x128xf32>
    %cst_37 = arith.constant dense<0.000000e+00> : vector<2x128xf32>
    %143 = tpu.matmul %140, %142, %cst_37 {dimension_numbers = #tpu.dot_dimension_numbers<[1], [0], [0], [1], [0, 0, 1, 1], [], []>} : vector<2x32xf32>, vector<32x128xf32>, vector<2x128xf32> -> vector<2x128xf32>
    %144 = arith.addf %141, %143 : vector<2x128xf32>
    %145 = arith.negf %144 : vector<2x128xf32>
    %146 = math.exp %145 : vector<2x128xf32>
    %cst_38 = arith.constant 1.000000e+00 : f32
    %147 = vector.broadcast %cst_38 : f32 to vector<2x128xf32>
    %148 = arith.addf %147, %146 : vector<2x128xf32>
    %149 = arith.divf %147, %148 : vector<2x128xf32>
    %150 = math.tanh %144 : vector<2x128xf32>
    %151 = vector.extract_strided_slice %149 {offsets = [0, 0], sizes = [2, 32], strides = [1, 1]} : vector<2x128xf32> to vector<2x32xf32>
    %152 = vector.extract_strided_slice %149 {offsets = [0, 32], sizes = [2, 32], strides = [1, 1]} : vector<2x128xf32> to vector<2x32xf32>
    %153 = vector.extract_strided_slice %150 {offsets = [0, 64], sizes = [2, 32], strides = [1, 1]} : vector<2x128xf32> to vector<2x32xf32>
    %154 = vector.extract_strided_slice %149 {offsets = [0, 96], sizes = [2, 32], strides = [1, 1]} : vector<2x128xf32> to vector<2x32xf32>
    %155 = arith.mulf %152, %138 : vector<2x32xf32>
    %156 = arith.mulf %151, %153 : vector<2x32xf32>
    %157 = arith.addf %155, %156 : vector<2x32xf32>
    %158 = math.tanh %157 : vector<2x32xf32>
    %159 = arith.mulf %154, %158 : vector<2x32xf32>
    %c0_39 = arith.constant 0 : index
    %c0_40 = arith.constant 0 : index
    %160 = vector.load %arg14[%c0_39, %c0_40] : memref<16x32xf32, #tpu.memory_space<vmem>>, vector<2x32xf32>
    tpu.vector_store %arg14[%c0_39, %c0_40], %26 {strides = array<i32>} : memref<16x32xf32, #tpu.memory_space<vmem>>, vector<2x32xf32>,
    %c2 = arith.constant 2 : index
    %c0_41 = arith.constant 0 : index
    %161 = vector.load %arg14[%c2, %c0_41] : memref<16x32xf32, #tpu.memory_space<vmem>>, vector<2x32xf32>
    tpu.vector_store %arg14[%c2, %c0_41], %45 {strides = array<i32>} : memref<16x32xf32, #tpu.memory_space<vmem>>, vector<2x32xf32>,
    %c4 = arith.constant 4 : index
    %c0_42 = arith.constant 0 : index
    %162 = vector.load %arg14[%c4, %c0_42] : memref<16x32xf32, #tpu.memory_space<vmem>>, vector<2x32xf32>
    tpu.vector_store %arg14[%c4, %c0_42], %64 {strides = array<i32>} : memref<16x32xf32, #tpu.memory_space<vmem>>, vector<2x32xf32>,
    %c6 = arith.constant 6 : index
    %c0_43 = arith.constant 0 : index
    %163 = vector.load %arg14[%c6, %c0_43] : memref<16x32xf32, #tpu.memory_space<vmem>>, vector<2x32xf32>
    tpu.vector_store %arg14[%c6, %c0_43], %83 {strides = array<i32>} : memref<16x32xf32, #tpu.memory_space<vmem>>, vector<2x32xf32>,
    %c8 = arith.constant 8 : index
    %c0_44 = arith.constant 0 : index
    %164 = vector.load %arg14[%c8, %c0_44] : memref<16x32xf32, #tpu.memory_space<vmem>>, vector<2x32xf32>
    tpu.vector_store %arg14[%c8, %c0_44], %102 {strides = array<i32>} : memref<16x32xf32, #tpu.memory_space<vmem>>, vector<2x32xf32>,
    %c10 = arith.constant 10 : index
    %c0_45 = arith.constant 0 : index
    %165 = vector.load %arg14[%c10, %c0_45] : memref<16x32xf32, #tpu.memory_space<vmem>>, vector<2x32xf32>
    tpu.vector_store %arg14[%c10, %c0_45], %121 {strides = array<i32>} : memref<16x32xf32, #tpu.memory_space<vmem>>, vector<2x32xf32>,
    %c12 = arith.constant 12 : index
    %c0_46 = arith.constant 0 : index
    %166 = vector.load %arg14[%c12, %c0_46] : memref<16x32xf32, #tpu.memory_space<vmem>>, vector<2x32xf32>
    tpu.vector_store %arg14[%c12, %c0_46], %140 {strides = array<i32>} : memref<16x32xf32, #tpu.memory_space<vmem>>, vector<2x32xf32>,
    %c14 = arith.constant 14 : index
    %c0_47 = arith.constant 0 : index
    %167 = vector.load %arg14[%c14, %c0_47] : memref<16x32xf32, #tpu.memory_space<vmem>>, vector<2x32xf32>
    tpu.vector_store %arg14[%c14, %c0_47], %159 {strides = array<i32>} : memref<16x32xf32, #tpu.memory_space<vmem>>, vector<2x32xf32>,
    %c0_48 = arith.constant 0 : index
    %c0_49 = arith.constant 0 : index
    %168 = vector.load %arg14[%c0_48, %c0_49] : memref<16x32xf32, #tpu.memory_space<vmem>>, vector<16x32xf32>
    %c0_50 = arith.constant 0 : index
    %c0_51 = arith.constant 0 : index
    %169 = vector.load %arg5[%c0_50, %c0_51] : memref<32x128xf32, #tpu.memory_space<vmem>>, vector<32x128xf32>
    %cst_52 = arith.constant dense<0.000000e+00> : vector<16x128xf32>
    %170 = tpu.matmul %168, %169, %cst_52 {dimension_numbers = #tpu.dot_dimension_numbers<[1], [0], [0], [1], [0, 0, 1, 1], [], []>} : vector<16x32xf32>, vector<32x128xf32>, vector<16x128xf32> -> vector<16x128xf32>
    %c0_53 = arith.constant 0 : index
    %c0_54 = arith.constant 0 : index
    %171 = vector.load %arg7[%c0_53, %c0_54] : memref<1x128xf32, #tpu.memory_space<vmem>>, vector<1x128xf32>
    %172 = vector.broadcast %171 : vector<1x128xf32> to vector<16x128xf32>
    %173 = arith.addf %170, %172 : vector<16x128xf32>
    %cst_55 = arith.constant 0.000000e+00 : f32
    %174 = vector.broadcast %cst_55 : f32 to vector<2x32xf32>
    %cst_56 = arith.constant 0.000000e+00 : f32
    %175 = vector.broadcast %cst_56 : f32 to vector<2x32xf32>
    %176 = vector.extract_strided_slice %173 {offsets = [0, 0], sizes = [2, 128], strides = [1, 1]} : vector<16x128xf32> to vector<2x128xf32>
    %c0_57 = arith.constant 0 : index
    %c0_58 = arith.constant 0 : index
    %177 = vector.load %arg6[%c0_57, %c0_58] : memref<32x128xf32, #tpu.memory_space<vmem>>, vector<32x128xf32>
    %cst_59 = arith.constant dense<0.000000e+00> : vector<2x128xf32>
    %178 = tpu.matmul %174, %177, %cst_59 {dimension_numbers = #tpu.dot_dimension_numbers<[1], [0], [0], [1], [0, 0, 1, 1], [], []>} : vector<2x32xf32>, vector<32x128xf32>, vector<2x128xf32> -> vector<2x128xf32>
    %179 = arith.addf %176, %178 : vector<2x128xf32>
    %180 = arith.negf %179 : vector<2x128xf32>
    %181 = math.exp %180 : vector<2x128xf32>
    %cst_60 = arith.constant 1.000000e+00 : f32
    %182 = vector.broadcast %cst_60 : f32 to vector<2x128xf32>
    %183 = arith.addf %182, %181 : vector<2x128xf32>
    %184 = arith.divf %182, %183 : vector<2x128xf32>
    %185 = math.tanh %179 : vector<2x128xf32>
    %186 = vector.extract_strided_slice %184 {offsets = [0, 0], sizes = [2, 32], strides = [1, 1]} : vector<2x128xf32> to vector<2x32xf32>
    %187 = vector.extract_strided_slice %184 {offsets = [0, 32], sizes = [2, 32], strides = [1, 1]} : vector<2x128xf32> to vector<2x32xf32>
    %188 = vector.extract_strided_slice %185 {offsets = [0, 64], sizes = [2, 32], strides = [1, 1]} : vector<2x128xf32> to vector<2x32xf32>
    %189 = vector.extract_strided_slice %184 {offsets = [0, 96], sizes = [2, 32], strides = [1, 1]} : vector<2x128xf32> to vector<2x32xf32>
    %190 = arith.mulf %187, %175 : vector<2x32xf32>
    %191 = arith.mulf %186, %188 : vector<2x32xf32>
    %192 = arith.addf %190, %191 : vector<2x32xf32>
    %193 = math.tanh %192 : vector<2x32xf32>
    %194 = arith.mulf %189, %193 : vector<2x32xf32>
    %195 = vector.extract_strided_slice %173 {offsets = [2, 0], sizes = [2, 128], strides = [1, 1]} : vector<16x128xf32> to vector<2x128xf32>
    %c0_61 = arith.constant 0 : index
    %c0_62 = arith.constant 0 : index
    %196 = vector.load %arg6[%c0_61, %c0_62] : memref<32x128xf32, #tpu.memory_space<vmem>>, vector<32x128xf32>
    %cst_63 = arith.constant dense<0.000000e+00> : vector<2x128xf32>
    %197 = tpu.matmul %194, %196, %cst_63 {dimension_numbers = #tpu.dot_dimension_numbers<[1], [0], [0], [1], [0, 0, 1, 1], [], []>} : vector<2x32xf32>, vector<32x128xf32>, vector<2x128xf32> -> vector<2x128xf32>
    %198 = arith.addf %195, %197 : vector<2x128xf32>
    %199 = arith.negf %198 : vector<2x128xf32>
    %200 = math.exp %199 : vector<2x128xf32>
    %cst_64 = arith.constant 1.000000e+00 : f32
    %201 = vector.broadcast %cst_64 : f32 to vector<2x128xf32>
    %202 = arith.addf %201, %200 : vector<2x128xf32>
    %203 = arith.divf %201, %202 : vector<2x128xf32>
    %204 = math.tanh %198 : vector<2x128xf32>
    %205 = vector.extract_strided_slice %203 {offsets = [0, 0], sizes = [2, 32], strides = [1, 1]} : vector<2x128xf32> to vector<2x32xf32>
    %206 = vector.extract_strided_slice %203 {offsets = [0, 32], sizes = [2, 32], strides = [1, 1]} : vector<2x128xf32> to vector<2x32xf32>
    %207 = vector.extract_strided_slice %204 {offsets = [0, 64], sizes = [2, 32], strides = [1, 1]} : vector<2x128xf32> to vector<2x32xf32>
    %208 = vector.extract_strided_slice %203 {offsets = [0, 96], sizes = [2, 32], strides = [1, 1]} : vector<2x128xf32> to vector<2x32xf32>
    %209 = arith.mulf %206, %192 : vector<2x32xf32>
    %210 = arith.mulf %205, %207 : vector<2x32xf32>
    %211 = arith.addf %209, %210 : vector<2x32xf32>
    %212 = math.tanh %211 : vector<2x32xf32>
    %213 = arith.mulf %208, %212 : vector<2x32xf32>
    %214 = vector.extract_strided_slice %173 {offsets = [4, 0], sizes = [2, 128], strides = [1, 1]} : vector<16x128xf32> to vector<2x128xf32>
    %c0_65 = arith.constant 0 : index
    %c0_66 = arith.constant 0 : index
    %215 = vector.load %arg6[%c0_65, %c0_66] : memref<32x128xf32, #tpu.memory_space<vmem>>, vector<32x128xf32>
    %cst_67 = arith.constant dense<0.000000e+00> : vector<2x128xf32>
    %216 = tpu.matmul %213, %215, %cst_67 {dimension_numbers = #tpu.dot_dimension_numbers<[1], [0], [0], [1], [0, 0, 1, 1], [], []>} : vector<2x32xf32>, vector<32x128xf32>, vector<2x128xf32> -> vector<2x128xf32>
    %217 = arith.addf %214, %216 : vector<2x128xf32>
    %218 = arith.negf %217 : vector<2x128xf32>
    %219 = math.exp %218 : vector<2x128xf32>
    %cst_68 = arith.constant 1.000000e+00 : f32
    %220 = vector.broadcast %cst_68 : f32 to vector<2x128xf32>
    %221 = arith.addf %220, %219 : vector<2x128xf32>
    %222 = arith.divf %220, %221 : vector<2x128xf32>
    %223 = math.tanh %217 : vector<2x128xf32>
    %224 = vector.extract_strided_slice %222 {offsets = [0, 0], sizes = [2, 32], strides = [1, 1]} : vector<2x128xf32> to vector<2x32xf32>
    %225 = vector.extract_strided_slice %222 {offsets = [0, 32], sizes = [2, 32], strides = [1, 1]} : vector<2x128xf32> to vector<2x32xf32>
    %226 = vector.extract_strided_slice %223 {offsets = [0, 64], sizes = [2, 32], strides = [1, 1]} : vector<2x128xf32> to vector<2x32xf32>
    %227 = vector.extract_strided_slice %222 {offsets = [0, 96], sizes = [2, 32], strides = [1, 1]} : vector<2x128xf32> to vector<2x32xf32>
    %228 = arith.mulf %225, %211 : vector<2x32xf32>
    %229 = arith.mulf %224, %226 : vector<2x32xf32>
    %230 = arith.addf %228, %229 : vector<2x32xf32>
    %231 = math.tanh %230 : vector<2x32xf32>
    %232 = arith.mulf %227, %231 : vector<2x32xf32>
    %233 = vector.extract_strided_slice %173 {offsets = [6, 0], sizes = [2, 128], strides = [1, 1]} : vector<16x128xf32> to vector<2x128xf32>
    %c0_69 = arith.constant 0 : index
    %c0_70 = arith.constant 0 : index
    %234 = vector.load %arg6[%c0_69, %c0_70] : memref<32x128xf32, #tpu.memory_space<vmem>>, vector<32x128xf32>
    %cst_71 = arith.constant dense<0.000000e+00> : vector<2x128xf32>
    %235 = tpu.matmul %232, %234, %cst_71 {dimension_numbers = #tpu.dot_dimension_numbers<[1], [0], [0], [1], [0, 0, 1, 1], [], []>} : vector<2x32xf32>, vector<32x128xf32>, vector<2x128xf32> -> vector<2x128xf32>
    %236 = arith.addf %233, %235 : vector<2x128xf32>
    %237 = arith.negf %236 : vector<2x128xf32>
    %238 = math.exp %237 : vector<2x128xf32>
    %cst_72 = arith.constant 1.000000e+00 : f32
    %239 = vector.broadcast %cst_72 : f32 to vector<2x128xf32>
    %240 = arith.addf %239, %238 : vector<2x128xf32>
    %241 = arith.divf %239, %240 : vector<2x128xf32>
    %242 = math.tanh %236 : vector<2x128xf32>
    %243 = vector.extract_strided_slice %241 {offsets = [0, 0], sizes = [2, 32], strides = [1, 1]} : vector<2x128xf32> to vector<2x32xf32>
    %244 = vector.extract_strided_slice %241 {offsets = [0, 32], sizes = [2, 32], strides = [1, 1]} : vector<2x128xf32> to vector<2x32xf32>
    %245 = vector.extract_strided_slice %242 {offsets = [0, 64], sizes = [2, 32], strides = [1, 1]} : vector<2x128xf32> to vector<2x32xf32>
    %246 = vector.extract_strided_slice %241 {offsets = [0, 96], sizes = [2, 32], strides = [1, 1]} : vector<2x128xf32> to vector<2x32xf32>
    %247 = arith.mulf %244, %230 : vector<2x32xf32>
    %248 = arith.mulf %243, %245 : vector<2x32xf32>
    %249 = arith.addf %247, %248 : vector<2x32xf32>
    %250 = math.tanh %249 : vector<2x32xf32>
    %251 = arith.mulf %246, %250 : vector<2x32xf32>
    %252 = vector.extract_strided_slice %173 {offsets = [8, 0], sizes = [2, 128], strides = [1, 1]} : vector<16x128xf32> to vector<2x128xf32>
    %c0_73 = arith.constant 0 : index
    %c0_74 = arith.constant 0 : index
    %253 = vector.load %arg6[%c0_73, %c0_74] : memref<32x128xf32, #tpu.memory_space<vmem>>, vector<32x128xf32>
    %cst_75 = arith.constant dense<0.000000e+00> : vector<2x128xf32>
    %254 = tpu.matmul %251, %253, %cst_75 {dimension_numbers = #tpu.dot_dimension_numbers<[1], [0], [0], [1], [0, 0, 1, 1], [], []>} : vector<2x32xf32>, vector<32x128xf32>, vector<2x128xf32> -> vector<2x128xf32>
    %255 = arith.addf %252, %254 : vector<2x128xf32>
    %256 = arith.negf %255 : vector<2x128xf32>
    %257 = math.exp %256 : vector<2x128xf32>
    %cst_76 = arith.constant 1.000000e+00 : f32
    %258 = vector.broadcast %cst_76 : f32 to vector<2x128xf32>
    %259 = arith.addf %258, %257 : vector<2x128xf32>
    %260 = arith.divf %258, %259 : vector<2x128xf32>
    %261 = math.tanh %255 : vector<2x128xf32>
    %262 = vector.extract_strided_slice %260 {offsets = [0, 0], sizes = [2, 32], strides = [1, 1]} : vector<2x128xf32> to vector<2x32xf32>
    %263 = vector.extract_strided_slice %260 {offsets = [0, 32], sizes = [2, 32], strides = [1, 1]} : vector<2x128xf32> to vector<2x32xf32>
    %264 = vector.extract_strided_slice %261 {offsets = [0, 64], sizes = [2, 32], strides = [1, 1]} : vector<2x128xf32> to vector<2x32xf32>
    %265 = vector.extract_strided_slice %260 {offsets = [0, 96], sizes = [2, 32], strides = [1, 1]} : vector<2x128xf32> to vector<2x32xf32>
    %266 = arith.mulf %263, %249 : vector<2x32xf32>
    %267 = arith.mulf %262, %264 : vector<2x32xf32>
    %268 = arith.addf %266, %267 : vector<2x32xf32>
    %269 = math.tanh %268 : vector<2x32xf32>
    %270 = arith.mulf %265, %269 : vector<2x32xf32>
    %271 = vector.extract_strided_slice %173 {offsets = [10, 0], sizes = [2, 128], strides = [1, 1]} : vector<16x128xf32> to vector<2x128xf32>
    %c0_77 = arith.constant 0 : index
    %c0_78 = arith.constant 0 : index
    %272 = vector.load %arg6[%c0_77, %c0_78] : memref<32x128xf32, #tpu.memory_space<vmem>>, vector<32x128xf32>
    %cst_79 = arith.constant dense<0.000000e+00> : vector<2x128xf32>
    %273 = tpu.matmul %270, %272, %cst_79 {dimension_numbers = #tpu.dot_dimension_numbers<[1], [0], [0], [1], [0, 0, 1, 1], [], []>} : vector<2x32xf32>, vector<32x128xf32>, vector<2x128xf32> -> vector<2x128xf32>
    %274 = arith.addf %271, %273 : vector<2x128xf32>
    %275 = arith.negf %274 : vector<2x128xf32>
    %276 = math.exp %275 : vector<2x128xf32>
    %cst_80 = arith.constant 1.000000e+00 : f32
    %277 = vector.broadcast %cst_80 : f32 to vector<2x128xf32>
    %278 = arith.addf %277, %276 : vector<2x128xf32>
    %279 = arith.divf %277, %278 : vector<2x128xf32>
    %280 = math.tanh %274 : vector<2x128xf32>
    %281 = vector.extract_strided_slice %279 {offsets = [0, 0], sizes = [2, 32], strides = [1, 1]} : vector<2x128xf32> to vector<2x32xf32>
    %282 = vector.extract_strided_slice %279 {offsets = [0, 32], sizes = [2, 32], strides = [1, 1]} : vector<2x128xf32> to vector<2x32xf32>
    %283 = vector.extract_strided_slice %280 {offsets = [0, 64], sizes = [2, 32], strides = [1, 1]} : vector<2x128xf32> to vector<2x32xf32>
    %284 = vector.extract_strided_slice %279 {offsets = [0, 96], sizes = [2, 32], strides = [1, 1]} : vector<2x128xf32> to vector<2x32xf32>
    %285 = arith.mulf %282, %268 : vector<2x32xf32>
    %286 = arith.mulf %281, %283 : vector<2x32xf32>
    %287 = arith.addf %285, %286 : vector<2x32xf32>
    %288 = math.tanh %287 : vector<2x32xf32>
    %289 = arith.mulf %284, %288 : vector<2x32xf32>
    %290 = vector.extract_strided_slice %173 {offsets = [12, 0], sizes = [2, 128], strides = [1, 1]} : vector<16x128xf32> to vector<2x128xf32>
    %c0_81 = arith.constant 0 : index
    %c0_82 = arith.constant 0 : index
    %291 = vector.load %arg6[%c0_81, %c0_82] : memref<32x128xf32, #tpu.memory_space<vmem>>, vector<32x128xf32>
    %cst_83 = arith.constant dense<0.000000e+00> : vector<2x128xf32>
    %292 = tpu.matmul %289, %291, %cst_83 {dimension_numbers = #tpu.dot_dimension_numbers<[1], [0], [0], [1], [0, 0, 1, 1], [], []>} : vector<2x32xf32>, vector<32x128xf32>, vector<2x128xf32> -> vector<2x128xf32>
    %293 = arith.addf %290, %292 : vector<2x128xf32>
    %294 = arith.negf %293 : vector<2x128xf32>
    %295 = math.exp %294 : vector<2x128xf32>
    %cst_84 = arith.constant 1.000000e+00 : f32
    %296 = vector.broadcast %cst_84 : f32 to vector<2x128xf32>
    %297 = arith.addf %296, %295 : vector<2x128xf32>
    %298 = arith.divf %296, %297 : vector<2x128xf32>
    %299 = math.tanh %293 : vector<2x128xf32>
    %300 = vector.extract_strided_slice %298 {offsets = [0, 0], sizes = [2, 32], strides = [1, 1]} : vector<2x128xf32> to vector<2x32xf32>
    %301 = vector.extract_strided_slice %298 {offsets = [0, 32], sizes = [2, 32], strides = [1, 1]} : vector<2x128xf32> to vector<2x32xf32>
    %302 = vector.extract_strided_slice %299 {offsets = [0, 64], sizes = [2, 32], strides = [1, 1]} : vector<2x128xf32> to vector<2x32xf32>
    %303 = vector.extract_strided_slice %298 {offsets = [0, 96], sizes = [2, 32], strides = [1, 1]} : vector<2x128xf32> to vector<2x32xf32>
    %304 = arith.mulf %301, %287 : vector<2x32xf32>
    %305 = arith.mulf %300, %302 : vector<2x32xf32>
    %306 = arith.addf %304, %305 : vector<2x32xf32>
    %307 = math.tanh %306 : vector<2x32xf32>
    %308 = arith.mulf %303, %307 : vector<2x32xf32>
    %309 = vector.extract_strided_slice %173 {offsets = [14, 0], sizes = [2, 128], strides = [1, 1]} : vector<16x128xf32> to vector<2x128xf32>
    %c0_85 = arith.constant 0 : index
    %c0_86 = arith.constant 0 : index
    %310 = vector.load %arg6[%c0_85, %c0_86] : memref<32x128xf32, #tpu.memory_space<vmem>>, vector<32x128xf32>
    %cst_87 = arith.constant dense<0.000000e+00> : vector<2x128xf32>
    %311 = tpu.matmul %308, %310, %cst_87 {dimension_numbers = #tpu.dot_dimension_numbers<[1], [0], [0], [1], [0, 0, 1, 1], [], []>} : vector<2x32xf32>, vector<32x128xf32>, vector<2x128xf32> -> vector<2x128xf32>
    %312 = arith.addf %309, %311 : vector<2x128xf32>
    %313 = arith.negf %312 : vector<2x128xf32>
    %314 = math.exp %313 : vector<2x128xf32>
    %cst_88 = arith.constant 1.000000e+00 : f32
    %315 = vector.broadcast %cst_88 : f32 to vector<2x128xf32>
    %316 = arith.addf %315, %314 : vector<2x128xf32>
    %317 = arith.divf %315, %316 : vector<2x128xf32>
    %318 = math.tanh %312 : vector<2x128xf32>
    %319 = vector.extract_strided_slice %317 {offsets = [0, 0], sizes = [2, 32], strides = [1, 1]} : vector<2x128xf32> to vector<2x32xf32>
    %320 = vector.extract_strided_slice %317 {offsets = [0, 32], sizes = [2, 32], strides = [1, 1]} : vector<2x128xf32> to vector<2x32xf32>
    %321 = vector.extract_strided_slice %318 {offsets = [0, 64], sizes = [2, 32], strides = [1, 1]} : vector<2x128xf32> to vector<2x32xf32>
    %322 = vector.extract_strided_slice %317 {offsets = [0, 96], sizes = [2, 32], strides = [1, 1]} : vector<2x128xf32> to vector<2x32xf32>
    %323 = arith.mulf %320, %306 : vector<2x32xf32>
    %324 = arith.mulf %319, %321 : vector<2x32xf32>
    %325 = arith.addf %323, %324 : vector<2x32xf32>
    %326 = math.tanh %325 : vector<2x32xf32>
    %327 = arith.mulf %322, %326 : vector<2x32xf32>
    %c0_89 = arith.constant 0 : index
    %c0_90 = arith.constant 0 : index
    %328 = vector.load %arg14[%c0_89, %c0_90] : memref<16x32xf32, #tpu.memory_space<vmem>>, vector<2x32xf32>
    tpu.vector_store %arg14[%c0_89, %c0_90], %194 {strides = array<i32>} : memref<16x32xf32, #tpu.memory_space<vmem>>, vector<2x32xf32>,
    %c2_91 = arith.constant 2 : index
    %c0_92 = arith.constant 0 : index
    %329 = vector.load %arg14[%c2_91, %c0_92] : memref<16x32xf32, #tpu.memory_space<vmem>>, vector<2x32xf32>
    tpu.vector_store %arg14[%c2_91, %c0_92], %213 {strides = array<i32>} : memref<16x32xf32, #tpu.memory_space<vmem>>, vector<2x32xf32>,
    %c4_93 = arith.constant 4 : index
    %c0_94 = arith.constant 0 : index
    %330 = vector.load %arg14[%c4_93, %c0_94] : memref<16x32xf32, #tpu.memory_space<vmem>>, vector<2x32xf32>
    tpu.vector_store %arg14[%c4_93, %c0_94], %232 {strides = array<i32>} : memref<16x32xf32, #tpu.memory_space<vmem>>, vector<2x32xf32>,
    %c6_95 = arith.constant 6 : index
    %c0_96 = arith.constant 0 : index
    %331 = vector.load %arg14[%c6_95, %c0_96] : memref<16x32xf32, #tpu.memory_space<vmem>>, vector<2x32xf32>
    tpu.vector_store %arg14[%c6_95, %c0_96], %251 {strides = array<i32>} : memref<16x32xf32, #tpu.memory_space<vmem>>, vector<2x32xf32>,
    %c8_97 = arith.constant 8 : index
    %c0_98 = arith.constant 0 : index
    %332 = vector.load %arg14[%c8_97, %c0_98] : memref<16x32xf32, #tpu.memory_space<vmem>>, vector<2x32xf32>
    tpu.vector_store %arg14[%c8_97, %c0_98], %270 {strides = array<i32>} : memref<16x32xf32, #tpu.memory_space<vmem>>, vector<2x32xf32>,
    %c10_99 = arith.constant 10 : index
    %c0_100 = arith.constant 0 : index
    %333 = vector.load %arg14[%c10_99, %c0_100] : memref<16x32xf32, #tpu.memory_space<vmem>>, vector<2x32xf32>
    tpu.vector_store %arg14[%c10_99, %c0_100], %289 {strides = array<i32>} : memref<16x32xf32, #tpu.memory_space<vmem>>, vector<2x32xf32>,
    %c12_101 = arith.constant 12 : index
    %c0_102 = arith.constant 0 : index
    %334 = vector.load %arg14[%c12_101, %c0_102] : memref<16x32xf32, #tpu.memory_space<vmem>>, vector<2x32xf32>
    tpu.vector_store %arg14[%c12_101, %c0_102], %308 {strides = array<i32>} : memref<16x32xf32, #tpu.memory_space<vmem>>, vector<2x32xf32>,
    %c14_103 = arith.constant 14 : index
    %c0_104 = arith.constant 0 : index
    %335 = vector.load %arg14[%c14_103, %c0_104] : memref<16x32xf32, #tpu.memory_space<vmem>>, vector<2x32xf32>
    tpu.vector_store %arg14[%c14_103, %c0_104], %327 {strides = array<i32>} : memref<16x32xf32, #tpu.memory_space<vmem>>, vector<2x32xf32>,
    %c0_105 = arith.constant 0 : index
    %c0_106 = arith.constant 0 : index
    %336 = vector.load %arg1[%c0_105, %c0_106] : memref<2x1xf32, #tpu.memory_space<vmem>>, vector<2x1xf32>
    %c0_107 = arith.constant 0 : index
    %c0_108 = arith.constant 0 : index
    %337 = vector.load %arg14[%c0_107, %c0_108] : memref<16x32xf32, #tpu.memory_space<vmem>>, vector<16x32xf32>
    %c0_109 = arith.constant 0 : index
    %c0_110 = arith.constant 0 : index
    %338 = vector.load %arg8[%c0_109, %c0_110] : memref<32x128xf32, #tpu.memory_space<vmem>>, vector<32x128xf32>
    %cst_111 = arith.constant dense<0.000000e+00> : vector<16x128xf32>
    %339 = tpu.matmul %337, %338, %cst_111 {dimension_numbers = #tpu.dot_dimension_numbers<[1], [0], [0], [1], [0, 0, 1, 1], [], []>} : vector<16x32xf32>, vector<32x128xf32>, vector<16x128xf32> -> vector<16x128xf32>
    %c0_112 = arith.constant 0 : index
    %c0_113 = arith.constant 0 : index
    %340 = vector.load %arg10[%c0_112, %c0_113] : memref<1x128xf32, #tpu.memory_space<vmem>>, vector<1x128xf32>
    %341 = vector.broadcast %340 : vector<1x128xf32> to vector<16x128xf32>
    %342 = arith.addf %339, %341 : vector<16x128xf32>
    %cst_114 = arith.constant 0.000000e+00 : f32
    %343 = vector.broadcast %cst_114 : f32 to vector<2x32xf32>
    %cst_115 = arith.constant 0.000000e+00 : f32
    %344 = vector.broadcast %cst_115 : f32 to vector<2x32xf32>
    %345 = vector.extract_strided_slice %342 {offsets = [0, 0], sizes = [2, 128], strides = [1, 1]} : vector<16x128xf32> to vector<2x128xf32>
    %c0_116 = arith.constant 0 : index
    %c0_117 = arith.constant 0 : index
    %346 = vector.load %arg9[%c0_116, %c0_117] : memref<32x128xf32, #tpu.memory_space<vmem>>, vector<32x128xf32>
    %cst_118 = arith.constant dense<0.000000e+00> : vector<2x128xf32>
    %347 = tpu.matmul %343, %346, %cst_118 {dimension_numbers = #tpu.dot_dimension_numbers<[1], [0], [0], [1], [0, 0, 1, 1], [], []>} : vector<2x32xf32>, vector<32x128xf32>, vector<2x128xf32> -> vector<2x128xf32>
    %348 = arith.addf %345, %347 : vector<2x128xf32>
    %349 = arith.negf %348 : vector<2x128xf32>
    %350 = math.exp %349 : vector<2x128xf32>
    %cst_119 = arith.constant 1.000000e+00 : f32
    %351 = vector.broadcast %cst_119 : f32 to vector<2x128xf32>
    %352 = arith.addf %351, %350 : vector<2x128xf32>
    %353 = arith.divf %351, %352 : vector<2x128xf32>
    %354 = math.tanh %348 : vector<2x128xf32>
    %355 = vector.extract_strided_slice %353 {offsets = [0, 0], sizes = [2, 32], strides = [1, 1]} : vector<2x128xf32> to vector<2x32xf32>
    %356 = vector.extract_strided_slice %353 {offsets = [0, 32], sizes = [2, 32], strides = [1, 1]} : vector<2x128xf32> to vector<2x32xf32>
    %357 = vector.extract_strided_slice %354 {offsets = [0, 64], sizes = [2, 32], strides = [1, 1]} : vector<2x128xf32> to vector<2x32xf32>
    %358 = vector.extract_strided_slice %353 {offsets = [0, 96], sizes = [2, 32], strides = [1, 1]} : vector<2x128xf32> to vector<2x32xf32>
    %359 = arith.mulf %356, %344 : vector<2x32xf32>
    %360 = arith.mulf %355, %357 : vector<2x32xf32>
    %361 = arith.addf %359, %360 : vector<2x32xf32>
    %362 = math.tanh %361 : vector<2x32xf32>
    %363 = arith.mulf %358, %362 : vector<2x32xf32>
    %364 = vector.extract_strided_slice %342 {offsets = [2, 0], sizes = [2, 128], strides = [1, 1]} : vector<16x128xf32> to vector<2x128xf32>
    %c0_120 = arith.constant 0 : index
    %c0_121 = arith.constant 0 : index
    %365 = vector.load %arg9[%c0_120, %c0_121] : memref<32x128xf32, #tpu.memory_space<vmem>>, vector<32x128xf32>
    %cst_122 = arith.constant dense<0.000000e+00> : vector<2x128xf32>
    %366 = tpu.matmul %363, %365, %cst_122 {dimension_numbers = #tpu.dot_dimension_numbers<[1], [0], [0], [1], [0, 0, 1, 1], [], []>} : vector<2x32xf32>, vector<32x128xf32>, vector<2x128xf32> -> vector<2x128xf32>
    %367 = arith.addf %364, %366 : vector<2x128xf32>
    %368 = arith.negf %367 : vector<2x128xf32>
    %369 = math.exp %368 : vector<2x128xf32>
    %cst_123 = arith.constant 1.000000e+00 : f32
    %370 = vector.broadcast %cst_123 : f32 to vector<2x128xf32>
    %371 = arith.addf %370, %369 : vector<2x128xf32>
    %372 = arith.divf %370, %371 : vector<2x128xf32>
    %373 = math.tanh %367 : vector<2x128xf32>
    %374 = vector.extract_strided_slice %372 {offsets = [0, 0], sizes = [2, 32], strides = [1, 1]} : vector<2x128xf32> to vector<2x32xf32>
    %375 = vector.extract_strided_slice %372 {offsets = [0, 32], sizes = [2, 32], strides = [1, 1]} : vector<2x128xf32> to vector<2x32xf32>
    %376 = vector.extract_strided_slice %373 {offsets = [0, 64], sizes = [2, 32], strides = [1, 1]} : vector<2x128xf32> to vector<2x32xf32>
    %377 = vector.extract_strided_slice %372 {offsets = [0, 96], sizes = [2, 32], strides = [1, 1]} : vector<2x128xf32> to vector<2x32xf32>
    %378 = arith.mulf %375, %361 : vector<2x32xf32>
    %379 = arith.mulf %374, %376 : vector<2x32xf32>
    %380 = arith.addf %378, %379 : vector<2x32xf32>
    %381 = math.tanh %380 : vector<2x32xf32>
    %382 = arith.mulf %377, %381 : vector<2x32xf32>
    %383 = vector.extract_strided_slice %342 {offsets = [4, 0], sizes = [2, 128], strides = [1, 1]} : vector<16x128xf32> to vector<2x128xf32>
    %c0_124 = arith.constant 0 : index
    %c0_125 = arith.constant 0 : index
    %384 = vector.load %arg9[%c0_124, %c0_125] : memref<32x128xf32, #tpu.memory_space<vmem>>, vector<32x128xf32>
    %cst_126 = arith.constant dense<0.000000e+00> : vector<2x128xf32>
    %385 = tpu.matmul %382, %384, %cst_126 {dimension_numbers = #tpu.dot_dimension_numbers<[1], [0], [0], [1], [0, 0, 1, 1], [], []>} : vector<2x32xf32>, vector<32x128xf32>, vector<2x128xf32> -> vector<2x128xf32>
    %386 = arith.addf %383, %385 : vector<2x128xf32>
    %387 = arith.negf %386 : vector<2x128xf32>
    %388 = math.exp %387 : vector<2x128xf32>
    %cst_127 = arith.constant 1.000000e+00 : f32
    %389 = vector.broadcast %cst_127 : f32 to vector<2x128xf32>
    %390 = arith.addf %389, %388 : vector<2x128xf32>
    %391 = arith.divf %389, %390 : vector<2x128xf32>
    %392 = math.tanh %386 : vector<2x128xf32>
    %393 = vector.extract_strided_slice %391 {offsets = [0, 0], sizes = [2, 32], strides = [1, 1]} : vector<2x128xf32> to vector<2x32xf32>
    %394 = vector.extract_strided_slice %391 {offsets = [0, 32], sizes = [2, 32], strides = [1, 1]} : vector<2x128xf32> to vector<2x32xf32>
    %395 = vector.extract_strided_slice %392 {offsets = [0, 64], sizes = [2, 32], strides = [1, 1]} : vector<2x128xf32> to vector<2x32xf32>
    %396 = vector.extract_strided_slice %391 {offsets = [0, 96], sizes = [2, 32], strides = [1, 1]} : vector<2x128xf32> to vector<2x32xf32>
    %397 = arith.mulf %394, %380 : vector<2x32xf32>
    %398 = arith.mulf %393, %395 : vector<2x32xf32>
    %399 = arith.addf %397, %398 : vector<2x32xf32>
    %400 = math.tanh %399 : vector<2x32xf32>
    %401 = arith.mulf %396, %400 : vector<2x32xf32>
    %402 = vector.extract_strided_slice %342 {offsets = [6, 0], sizes = [2, 128], strides = [1, 1]} : vector<16x128xf32> to vector<2x128xf32>
    %c0_128 = arith.constant 0 : index
    %c0_129 = arith.constant 0 : index
    %403 = vector.load %arg9[%c0_128, %c0_129] : memref<32x128xf32, #tpu.memory_space<vmem>>, vector<32x128xf32>
    %cst_130 = arith.constant dense<0.000000e+00> : vector<2x128xf32>
    %404 = tpu.matmul %401, %403, %cst_130 {dimension_numbers = #tpu.dot_dimension_numbers<[1], [0], [0], [1], [0, 0, 1, 1], [], []>} : vector<2x32xf32>, vector<32x128xf32>, vector<2x128xf32> -> vector<2x128xf32>
    %405 = arith.addf %402, %404 : vector<2x128xf32>
    %406 = arith.negf %405 : vector<2x128xf32>
    %407 = math.exp %406 : vector<2x128xf32>
    %cst_131 = arith.constant 1.000000e+00 : f32
    %408 = vector.broadcast %cst_131 : f32 to vector<2x128xf32>
    %409 = arith.addf %408, %407 : vector<2x128xf32>
    %410 = arith.divf %408, %409 : vector<2x128xf32>
    %411 = math.tanh %405 : vector<2x128xf32>
    %412 = vector.extract_strided_slice %410 {offsets = [0, 0], sizes = [2, 32], strides = [1, 1]} : vector<2x128xf32> to vector<2x32xf32>
    %413 = vector.extract_strided_slice %410 {offsets = [0, 32], sizes = [2, 32], strides = [1, 1]} : vector<2x128xf32> to vector<2x32xf32>
    %414 = vector.extract_strided_slice %411 {offsets = [0, 64], sizes = [2, 32], strides = [1, 1]} : vector<2x128xf32> to vector<2x32xf32>
    %415 = vector.extract_strided_slice %410 {offsets = [0, 96], sizes = [2, 32], strides = [1, 1]} : vector<2x128xf32> to vector<2x32xf32>
    %416 = arith.mulf %413, %399 : vector<2x32xf32>
    %417 = arith.mulf %412, %414 : vector<2x32xf32>
    %418 = arith.addf %416, %417 : vector<2x32xf32>
    %419 = math.tanh %418 : vector<2x32xf32>
    %420 = arith.mulf %415, %419 : vector<2x32xf32>
    %421 = vector.extract_strided_slice %342 {offsets = [8, 0], sizes = [2, 128], strides = [1, 1]} : vector<16x128xf32> to vector<2x128xf32>
    %c0_132 = arith.constant 0 : index
    %c0_133 = arith.constant 0 : index
    %422 = vector.load %arg9[%c0_132, %c0_133] : memref<32x128xf32, #tpu.memory_space<vmem>>, vector<32x128xf32>
    %cst_134 = arith.constant dense<0.000000e+00> : vector<2x128xf32>
    %423 = tpu.matmul %420, %422, %cst_134 {dimension_numbers = #tpu.dot_dimension_numbers<[1], [0], [0], [1], [0, 0, 1, 1], [], []>} : vector<2x32xf32>, vector<32x128xf32>, vector<2x128xf32> -> vector<2x128xf32>
    %424 = arith.addf %421, %423 : vector<2x128xf32>
    %425 = arith.negf %424 : vector<2x128xf32>
    %426 = math.exp %425 : vector<2x128xf32>
    %cst_135 = arith.constant 1.000000e+00 : f32
    %427 = vector.broadcast %cst_135 : f32 to vector<2x128xf32>
    %428 = arith.addf %427, %426 : vector<2x128xf32>
    %429 = arith.divf %427, %428 : vector<2x128xf32>
    %430 = math.tanh %424 : vector<2x128xf32>
    %431 = vector.extract_strided_slice %429 {offsets = [0, 0], sizes = [2, 32], strides = [1, 1]} : vector<2x128xf32> to vector<2x32xf32>
    %432 = vector.extract_strided_slice %429 {offsets = [0, 32], sizes = [2, 32], strides = [1, 1]} : vector<2x128xf32> to vector<2x32xf32>
    %433 = vector.extract_strided_slice %430 {offsets = [0, 64], sizes = [2, 32], strides = [1, 1]} : vector<2x128xf32> to vector<2x32xf32>
    %434 = vector.extract_strided_slice %429 {offsets = [0, 96], sizes = [2, 32], strides = [1, 1]} : vector<2x128xf32> to vector<2x32xf32>
    %435 = arith.mulf %432, %418 : vector<2x32xf32>
    %436 = arith.mulf %431, %433 : vector<2x32xf32>
    %437 = arith.addf %435, %436 : vector<2x32xf32>
    %438 = math.tanh %437 : vector<2x32xf32>
    %439 = arith.mulf %434, %438 : vector<2x32xf32>
    %440 = vector.extract_strided_slice %342 {offsets = [10, 0], sizes = [2, 128], strides = [1, 1]} : vector<16x128xf32> to vector<2x128xf32>
    %c0_136 = arith.constant 0 : index
    %c0_137 = arith.constant 0 : index
    %441 = vector.load %arg9[%c0_136, %c0_137] : memref<32x128xf32, #tpu.memory_space<vmem>>, vector<32x128xf32>
    %cst_138 = arith.constant dense<0.000000e+00> : vector<2x128xf32>
    %442 = tpu.matmul %439, %441, %cst_138 {dimension_numbers = #tpu.dot_dimension_numbers<[1], [0], [0], [1], [0, 0, 1, 1], [], []>} : vector<2x32xf32>, vector<32x128xf32>, vector<2x128xf32> -> vector<2x128xf32>
    %443 = arith.addf %440, %442 : vector<2x128xf32>
    %444 = arith.negf %443 : vector<2x128xf32>
    %445 = math.exp %444 : vector<2x128xf32>
    %cst_139 = arith.constant 1.000000e+00 : f32
    %446 = vector.broadcast %cst_139 : f32 to vector<2x128xf32>
    %447 = arith.addf %446, %445 : vector<2x128xf32>
    %448 = arith.divf %446, %447 : vector<2x128xf32>
    %449 = math.tanh %443 : vector<2x128xf32>
    %450 = vector.extract_strided_slice %448 {offsets = [0, 0], sizes = [2, 32], strides = [1, 1]} : vector<2x128xf32> to vector<2x32xf32>
    %451 = vector.extract_strided_slice %448 {offsets = [0, 32], sizes = [2, 32], strides = [1, 1]} : vector<2x128xf32> to vector<2x32xf32>
    %452 = vector.extract_strided_slice %449 {offsets = [0, 64], sizes = [2, 32], strides = [1, 1]} : vector<2x128xf32> to vector<2x32xf32>
    %453 = vector.extract_strided_slice %448 {offsets = [0, 96], sizes = [2, 32], strides = [1, 1]} : vector<2x128xf32> to vector<2x32xf32>
    %454 = arith.mulf %451, %437 : vector<2x32xf32>
    %455 = arith.mulf %450, %452 : vector<2x32xf32>
    %456 = arith.addf %454, %455 : vector<2x32xf32>
    %457 = math.tanh %456 : vector<2x32xf32>
    %458 = arith.mulf %453, %457 : vector<2x32xf32>
    %459 = vector.extract_strided_slice %342 {offsets = [12, 0], sizes = [2, 128], strides = [1, 1]} : vector<16x128xf32> to vector<2x128xf32>
    %c0_140 = arith.constant 0 : index
    %c0_141 = arith.constant 0 : index
    %460 = vector.load %arg9[%c0_140, %c0_141] : memref<32x128xf32, #tpu.memory_space<vmem>>, vector<32x128xf32>
    %cst_142 = arith.constant dense<0.000000e+00> : vector<2x128xf32>
    %461 = tpu.matmul %458, %460, %cst_142 {dimension_numbers = #tpu.dot_dimension_numbers<[1], [0], [0], [1], [0, 0, 1, 1], [], []>} : vector<2x32xf32>, vector<32x128xf32>, vector<2x128xf32> -> vector<2x128xf32>
    %462 = arith.addf %459, %461 : vector<2x128xf32>
    %463 = arith.negf %462 : vector<2x128xf32>
    %464 = math.exp %463 : vector<2x128xf32>
    %cst_143 = arith.constant 1.000000e+00 : f32
    %465 = vector.broadcast %cst_143 : f32 to vector<2x128xf32>
    %466 = arith.addf %465, %464 : vector<2x128xf32>
    %467 = arith.divf %465, %466 : vector<2x128xf32>
    %468 = math.tanh %462 : vector<2x128xf32>
    %469 = vector.extract_strided_slice %467 {offsets = [0, 0], sizes = [2, 32], strides = [1, 1]} : vector<2x128xf32> to vector<2x32xf32>
    %470 = vector.extract_strided_slice %467 {offsets = [0, 32], sizes = [2, 32], strides = [1, 1]} : vector<2x128xf32> to vector<2x32xf32>
    %471 = vector.extract_strided_slice %468 {offsets = [0, 64], sizes = [2, 32], strides = [1, 1]} : vector<2x128xf32> to vector<2x32xf32>
    %472 = vector.extract_strided_slice %467 {offsets = [0, 96], sizes = [2, 32], strides = [1, 1]} : vector<2x128xf32> to vector<2x32xf32>
    %473 = arith.mulf %470, %456 : vector<2x32xf32>
    %474 = arith.mulf %469, %471 : vector<2x32xf32>
    %475 = arith.addf %473, %474 : vector<2x32xf32>
    %476 = math.tanh %475 : vector<2x32xf32>
    %477 = arith.mulf %472, %476 : vector<2x32xf32>
    %478 = vector.extract_strided_slice %342 {offsets = [14, 0], sizes = [2, 128], strides = [1, 1]} : vector<16x128xf32> to vector<2x128xf32>
    %c0_144 = arith.constant 0 : index
    %c0_145 = arith.constant 0 : index
    %479 = vector.load %arg9[%c0_144, %c0_145] : memref<32x128xf32, #tpu.memory_space<vmem>>, vector<32x128xf32>
    %cst_146 = arith.constant dense<0.000000e+00> : vector<2x128xf32>
    %480 = tpu.matmul %477, %479, %cst_146 {dimension_numbers = #tpu.dot_dimension_numbers<[1], [0], [0], [1], [0, 0, 1, 1], [], []>} : vector<2x32xf32>, vector<32x128xf32>, vector<2x128xf32> -> vector<2x128xf32>
    %481 = arith.addf %478, %480 : vector<2x128xf32>
    %482 = arith.negf %481 : vector<2x128xf32>
    %483 = math.exp %482 : vector<2x128xf32>
    %cst_147 = arith.constant 1.000000e+00 : f32
    %484 = vector.broadcast %cst_147 : f32 to vector<2x128xf32>
    %485 = arith.addf %484, %483 : vector<2x128xf32>
    %486 = arith.divf %484, %485 : vector<2x128xf32>
    %487 = math.tanh %481 : vector<2x128xf32>
    %488 = vector.extract_strided_slice %486 {offsets = [0, 0], sizes = [2, 32], strides = [1, 1]} : vector<2x128xf32> to vector<2x32xf32>
    %489 = vector.extract_strided_slice %486 {offsets = [0, 32], sizes = [2, 32], strides = [1, 1]} : vector<2x128xf32> to vector<2x32xf32>
    %490 = vector.extract_strided_slice %487 {offsets = [0, 64], sizes = [2, 32], strides = [1, 1]} : vector<2x128xf32> to vector<2x32xf32>
    %491 = vector.extract_strided_slice %486 {offsets = [0, 96], sizes = [2, 32], strides = [1, 1]} : vector<2x128xf32> to vector<2x32xf32>
    %492 = arith.mulf %489, %475 : vector<2x32xf32>
    %493 = arith.mulf %488, %490 : vector<2x32xf32>
    %494 = arith.addf %492, %493 : vector<2x32xf32>
    %495 = math.tanh %494 : vector<2x32xf32>
    %496 = arith.mulf %491, %495 : vector<2x32xf32>
    %cst_148 = arith.constant 0.000000e+00 : f32
    %497 = vector.broadcast %cst_148 : f32 to vector<2x32xf32>
    %cst_149 = arith.constant 0.000000e+00 : f32
    %498 = vector.broadcast %cst_149 : f32 to vector<2x1xf32>
    %499 = arith.cmpf olt, %498, %336 : vector<2x1xf32>
    %500 = arith.extui %499 : vector<2x1xi1> to vector<2x1xi32>
    %501 = arith.sitofp %500 : vector<2x1xi32> to vector<2x1xf32>
    %502 = vector.broadcast %501 : vector<2x1xf32> to vector<2x32xf32>
    %503 = arith.mulf %502, %363 : vector<2x32xf32>
    %504 = arith.addf %497, %503 : vector<2x32xf32>
    %cst_150 = arith.constant 1.000000e+00 : f32
    %505 = vector.broadcast %cst_150 : f32 to vector<2x1xf32>
    %506 = arith.cmpf olt, %505, %336 : vector<2x1xf32>
    %507 = arith.extui %506 : vector<2x1xi1> to vector<2x1xi32>
    %508 = arith.sitofp %507 : vector<2x1xi32> to vector<2x1xf32>
    %509 = vector.broadcast %508 : vector<2x1xf32> to vector<2x32xf32>
    %510 = arith.mulf %509, %382 : vector<2x32xf32>
    %511 = arith.addf %504, %510 : vector<2x32xf32>
    %cst_151 = arith.constant 2.000000e+00 : f32
    %512 = vector.broadcast %cst_151 : f32 to vector<2x1xf32>
    %513 = arith.cmpf olt, %512, %336 : vector<2x1xf32>
    %514 = arith.extui %513 : vector<2x1xi1> to vector<2x1xi32>
    %515 = arith.sitofp %514 : vector<2x1xi32> to vector<2x1xf32>
    %516 = vector.broadcast %515 : vector<2x1xf32> to vector<2x32xf32>
    %517 = arith.mulf %516, %401 : vector<2x32xf32>
    %518 = arith.addf %511, %517 : vector<2x32xf32>
    %cst_152 = arith.constant 3.000000e+00 : f32
    %519 = vector.broadcast %cst_152 : f32 to vector<2x1xf32>
    %520 = arith.cmpf olt, %519, %336 : vector<2x1xf32>
    %521 = arith.extui %520 : vector<2x1xi1> to vector<2x1xi32>
    %522 = arith.sitofp %521 : vector<2x1xi32> to vector<2x1xf32>
    %523 = vector.broadcast %522 : vector<2x1xf32> to vector<2x32xf32>
    %524 = arith.mulf %523, %420 : vector<2x32xf32>
    %525 = arith.addf %518, %524 : vector<2x32xf32>
    %cst_153 = arith.constant 4.000000e+00 : f32
    %526 = vector.broadcast %cst_153 : f32 to vector<2x1xf32>
    %527 = arith.cmpf olt, %526, %336 : vector<2x1xf32>
    %528 = arith.extui %527 : vector<2x1xi1> to vector<2x1xi32>
    %529 = arith.sitofp %528 : vector<2x1xi32> to vector<2x1xf32>
    %530 = vector.broadcast %529 : vector<2x1xf32> to vector<2x32xf32>
    %531 = arith.mulf %530, %439 : vector<2x32xf32>
    %532 = arith.addf %525, %531 : vector<2x32xf32>
    %cst_154 = arith.constant 5.000000e+00 : f32
    %533 = vector.broadcast %cst_154 : f32 to vector<2x1xf32>
    %534 = arith.cmpf olt, %533, %336 : vector<2x1xf32>
    %535 = arith.extui %534 : vector<2x1xi1> to vector<2x1xi32>
    %536 = arith.sitofp %535 : vector<2x1xi32> to vector<2x1xf32>
    %537 = vector.broadcast %536 : vector<2x1xf32> to vector<2x32xf32>
    %538 = arith.mulf %537, %458 : vector<2x32xf32>
    %539 = arith.addf %532, %538 : vector<2x32xf32>
    %cst_155 = arith.constant 6.000000e+00 : f32
    %540 = vector.broadcast %cst_155 : f32 to vector<2x1xf32>
    %541 = arith.cmpf olt, %540, %336 : vector<2x1xf32>
    %542 = arith.extui %541 : vector<2x1xi1> to vector<2x1xi32>
    %543 = arith.sitofp %542 : vector<2x1xi32> to vector<2x1xf32>
    %544 = vector.broadcast %543 : vector<2x1xf32> to vector<2x32xf32>
    %545 = arith.mulf %544, %477 : vector<2x32xf32>
    %546 = arith.addf %539, %545 : vector<2x32xf32>
    %cst_156 = arith.constant 7.000000e+00 : f32
    %547 = vector.broadcast %cst_156 : f32 to vector<2x1xf32>
    %548 = arith.cmpf olt, %547, %336 : vector<2x1xf32>
    %549 = arith.extui %548 : vector<2x1xi1> to vector<2x1xi32>
    %550 = arith.sitofp %549 : vector<2x1xi32> to vector<2x1xf32>
    %551 = vector.broadcast %550 : vector<2x1xf32> to vector<2x32xf32>
    %552 = arith.mulf %551, %496 : vector<2x32xf32>
    %553 = arith.addf %546, %552 : vector<2x32xf32>
    %cst_157 = arith.constant 8.000000e+00 : f32
    %554 = vector.broadcast %cst_157 : f32 to vector<2x1xf32>
    %555 = arith.minimumf %336, %554 : vector<2x1xf32>
    %c0_158 = arith.constant 0 : index
    %c0_159 = arith.constant 0 : index
    %556 = vector.load %arg11[%c0_158, %c0_159] : memref<32x8xf32, #tpu.memory_space<vmem>>, vector<32x8xf32>
    %cst_160 = arith.constant dense<0.000000e+00> : vector<2x8xf32>
    %557 = tpu.matmul %553, %556, %cst_160 {dimension_numbers = #tpu.dot_dimension_numbers<[1], [0], [0], [1], [0, 0, 1, 1], [], []>} : vector<2x32xf32>, vector<32x8xf32>, vector<2x8xf32> -> vector<2x8xf32>
    %c0_161 = arith.constant 0 : index
    %c0_162 = arith.constant 0 : index
    %558 = vector.load %arg12[%c0_161, %c0_162] : memref<1x8xf32, #tpu.memory_space<vmem>>, vector<1x8xf32>
    %559 = vector.broadcast %558 : vector<1x8xf32> to vector<2x8xf32>
    %560 = vector.broadcast %555 : vector<2x1xf32> to vector<2x8xf32>
    %561 = arith.mulf %559, %560 : vector<2x8xf32>
    %562 = arith.addf %557, %561 : vector<2x8xf32>
    %cst_163 = arith.constant 0.00999999977 : f32
    %563 = vector.broadcast %cst_163 : f32 to vector<2x1xf32>
    %564 = arith.addf %336, %563 : vector<2x1xf32>
    %565 = tpu.reciprocal %564 {approx = true} : vector<2x1xf32> -> vector<2x1xf32>
    %566 = vector.broadcast %565 : vector<2x1xf32> to vector<2x8xf32>
    %567 = arith.mulf %562, %566 : vector<2x8xf32>
    %c0_164 = arith.constant 0 : index
    %c0_165 = arith.constant 0 : index
    %568 = vector.load %arg13[%c0_164, %c0_165] : memref<2x8xf32, #tpu.memory_space<vmem>>, vector<2x8xf32>
    tpu.vector_store %arg13[%c0_164, %c0_165], %567 {strides = array<i32>} : memref<2x8xf32, #tpu.memory_space<vmem>>, vector<2x8xf32>,
    return
  }
}

</mosaic_0001>

<bundles_post_ra>
// kernel: tpu_custom_call.1
= control target key start
LH: loop header
LB: loop body
LE: loop exit
PB: predicated region body
PF: predicated region fallthrough
CT: control target
= control target key end

     0   :  { %18 = vsyncpa [#allocation4], 0  ;;  %s4933_s0 = inlined_call_operand.hbm [shape: f32[16,24], index: 0, kind: input, shape index: {}]   ;;  %s4934_s1 = inlined_call_operand.vmem [shape: f32[2,1], index: 1, kind: input, shape index: {}]   ;;  %s4935_s2 = inlined_call_operand.hbm [shape: f32[24,128], index: 2, kind: input, shape index: {}]   ;;  %s4936_s3 = inlined_call_operand.vmem [shape: f32[32,128], index: 3, kind: input, shape index: {}]   ;;  %s4937_s4 = inlined_call_operand.vmem [shape: f32[1,128], index: 4, kind: input, shape index: {}]   ;;  %s4938_s5 = inlined_call_operand.hbm [shape: f32[32,128], index: 5, kind: input, shape index: {}]   ;;  %s4939_s6 = inlined_call_operand.vmem [shape: f32[32,128], index: 6, kind: input, shape index: {}]   ;;  %s4940_s7 = inlined_call_operand.vmem [shape: f32[1,128], index: 7, kind: input, shape index: {}]   ;;  %s4941_s8 = inlined_call_operand.hbm [shape: f32[32,128], index: 8, kind: input, shape index: {}]   ;;  %s4942_s9 = inlined_call_operand.hbm [shape: f32[32,128], index: 9, kind: input, shape index: {}]   ;;  %s4943_s10 = inlined_call_operand.vmem [shape: f32[1,128], index: 10, kind: input, shape index: {}]   ;;  %s4944_s11 = inlined_call_operand.vmem [shape: f32[32,8], index: 11, kind: input, shape index: {}]   ;;  %s4945_s12 = inlined_call_operand.vmem [shape: f32[1,8], index: 12, kind: input, shape index: {}]   ;;  %s4946_s13 = inlined_call_operand.hbm [shape: f32[2,8], index: 13, kind: output, shape index: {}]  }
   0x1   :  { %19 = vsyncpa [#allocation7], 0 }
   0x2   :  { %20 = vsyncpa [#allocation10], 0 }
   0x3   :  { %21 = vsyncpa [#allocation5], 0  ;;  %s4266_s25 = smov [#allocation6]   ;;  %s4267_s27 = smov [#allocation9]  }
   0x4   :  { %s41_s26 = sshll.u32 %s4266_s25, 4  ;;  %s73_s28 = sshll.u32 %s4267_s27, 4  ;;  %s42_s26 = int_to_ptr.vmem [resolvable:$true] %s41_s26  ;;  %s4351_s28 = int_to_ptr.vmem [resolvable:$true] %s73_s28 }
   0x5   :  { %s4126_s14 = scalar_lea.hbm %s4935_s2, 384 }
   0x6   :  { %p4127_p0 = scmp.ne.s32.totalorder %s4935_s2, %s4126_s14  ;;  %p4130_p1 = scmp.lt.u32.totalorder %s4126_s14, %s4935_s2 }
   0x8   :  { %p4132_p2 = pnand %p4130_p1, %p4127_p0 }
   0xa   :  { %4135 = shalt.err (!%p4132_p2)
}
   0xb   :  { %s4136_s19 = scalar_lea.vmem %s42_s26, 384  ;;  %p4141_p4 = scmp.lt.s32.totalorder %s42_s26, %s42_s26 }
   0xc   :  { %p4137_p3 = scmp.ne.s32.totalorder %s42_s26, %s4136_s19  ;;  %p4142_p5 = scmp.lt.s32.totalorder %s4136_s19, %s4136_s19 }
   0xe   :  { %p4143_p6 = por %p4142_p5, %p4141_p4 }
  0x10   :  { %p4144_p7 = pnand %p4143_p6, %p4137_p3 }
  0x12   :  { %4147 = shalt.err (!%p4144_p7)
}
  0x13   :  { %s4268_s20 = smov 128   ;;  %s4269_s21 = smov 8  }
  0x14   :  { %47 = dma.hbm_to_vmem [thread:$0]  %s4935_s2, 384, %s42_s26, [#allocation7], %s4268_s20, %s4268_s20, %s4269_s21  }
  0x15   :  { %s4148_s27 = scalar_lea.hbm %s4941_s8, 512 }
  0x16   :  { %p4149_p8 = scmp.ne.s32.totalorder %s4941_s8, %s4148_s27  ;;  %p4152_p9 = scmp.lt.u32.totalorder %s4148_s27, %s4941_s8 }
  0x18   :  { %p4154_p10 = pnand %p4152_p9, %p4149_p8 }
  0x1a   :  { %4157 = shalt.err (!%p4154_p10)
}
  0x1b   :  { %s4158_s16 = scalar_lea.vmem %s4351_s28, 512  ;;  %p4163_p12 = scmp.lt.s32.totalorder %s4351_s28, %s4351_s28 }
  0x1c   :  { %p4159_p11 = scmp.ne.s32.totalorder %s4351_s28, %s4158_s16  ;;  %p4164_p13 = scmp.lt.s32.totalorder %s4158_s16, %s4158_s16 }
  0x1e   :  { %p4165_p0 = por %p4164_p13, %p4163_p12 }
  0x20   :  { %p4166_p1 = pnand %p4165_p0, %p4159_p11 }
  0x22   :  { %4169 = shalt.err (!%p4166_p1)
}
  0x23   :  { %79 = dma.hbm_to_vmem [thread:$0]  %s4941_s8, 512, %s4351_s28, [#allocation10], %s4268_s20, %s4268_s20, %s4269_s21  }
  0x24   :  { %s4270_s17 = smov [#allocation3]   ;;  %s4271_s19 = smov [#allocation8]  }
  0x25   :  { %s27_s18 = sshll.u32 %s4270_s17, 4  ;;  %s57_s22 = sshll.u32 %s4271_s19, 4  ;;  %s28_s18 = int_to_ptr.vmem [resolvable:$true] %s27_s18  ;;  %s4388_s22 = int_to_ptr.vmem [resolvable:$true] %s57_s22 }
  0x26   :  { %s4170_s25 = scalar_lea.hbm %s4933_s0, 256 }
  0x27   :  { %p4171_p2 = scmp.ne.s32.totalorder %s4933_s0, %s4170_s25  ;;  %p4174_p3 = scmp.lt.u32.totalorder %s4170_s25, %s4933_s0 }
  0x29   :  { %p4176_p4 = pnand %p4174_p3, %p4171_p2 }
  0x2b   :  { %4179 = shalt.err (!%p4176_p4)
}
  0x2c   :  { %s4180_s8 = scalar_lea.vmem %s28_s18, 256  ;;  %p4185_p6 = scmp.lt.s32.totalorder %s28_s18, %s28_s18 }
  0x2d   :  { %p4181_p5 = scmp.ne.s32.totalorder %s28_s18, %s4180_s8  ;;  %p4186_p7 = scmp.lt.s32.totalorder %s4180_s8, %s4180_s8 }
  0x2f   :  { %p4187_p8 = por %p4186_p7, %p4185_p6 }
  0x31   :  { %p4188_p9 = pnand %p4187_p8, %p4181_p5 }
  0x33   :  { %4191 = shalt.err (!%p4188_p9)
}
  0x34   :  { %33 = dma.hbm_to_vmem [thread:$0]  %s4933_s0, 256, %s28_s18, [#allocation4], %s4268_s20, %s4268_s20, %s4269_s21  }
  0x35   :  { %s4192_s26 = scalar_lea.hbm %s4938_s5, 512 }
  0x36   :  { %p4193_p10 = scmp.ne.s32.totalorder %s4938_s5, %s4192_s26  ;;  %p4196_p11 = scmp.lt.u32.totalorder %s4192_s26, %s4938_s5 }
  0x38   :  { %p4198_p12 = pnand %p4196_p11, %p4193_p10 }
  0x3a   :  { %4201 = shalt.err (!%p4198_p12)
}
  0x3b   :  { %s4202_s25 = scalar_lea.vmem %s4388_s22, 512  ;;  %p4207_p0 = scmp.lt.s32.totalorder %s4388_s22, %s4388_s22 }
  0x3c   :  { %p4203_p13 = scmp.ne.s32.totalorder %s4388_s22, %s4202_s25  ;;  %p4208_p1 = scmp.lt.s32.totalorder %s4202_s25, %s4202_s25 }
  0x3e   :  { %p4209_p2 = por %p4208_p1, %p4207_p0 }
  0x40   :  { %p4210_p3 = pnand %p4209_p2, %p4203_p13 }
  0x42   :  { %4213 = shalt.err (!%p4210_p3)
}
  0x43   :  { %63 = dma.hbm_to_vmem [thread:$0]  %s4938_s5, 512, %s4388_s22, [#allocation7], %s4268_s20, %s4268_s20, %s4269_s21  }
  0x44   :  { %s4272_s27 = smov [#allocation11]   ;;  %s4214_s8 = scalar_lea.hbm %s4942_s9, 512 }
  0x45   :  { %s85_s29 = sshll.u32 %s4272_s27, 4  ;;  %p4215_p4 = scmp.ne.s32.totalorder %s4942_s9, %s4214_s8  ;;  %s86_s29 = int_to_ptr.vmem [resolvable:$true] %s85_s29 }
  0x46   :  { %p4218_p5 = scmp.lt.u32.totalorder %s4214_s8, %s4942_s9 }
  0x48   :  { %p4220_p6 = pnand %p4218_p5, %p4215_p4 }
  0x4a   :  { %4223 = shalt.err (!%p4220_p6)
}
  0x4b   :  { %s4224_s26 = scalar_lea.vmem %s86_s29, 512  ;;  %p4229_p8 = scmp.lt.s32.totalorder %s86_s29, %s86_s29 }
  0x4c   :  { %p4225_p7 = scmp.ne.s32.totalorder %s86_s29, %s4224_s26  ;;  %p4230_p9 = scmp.lt.s32.totalorder %s4224_s26, %s4224_s26 }
  0x4e   :  { %p4231_p10 = por %p4230_p9, %p4229_p8 }
  0x50   :  { %p4232_p11 = pnand %p4231_p10, %p4225_p7 }
  0x52   :  { %4235 = shalt.err (!%p4232_p11)
}
  0x53   :  { %91 = dma.hbm_to_vmem [thread:$0]  %s4942_s9, 512, %s86_s29, [#allocation10], %s4268_s20, %s4268_s20, %s4269_s21  }
  0x54   :  { %4258 = dma.done.wait [#allocation4], 256  }
  0x55   :  { %4259 = vsyncadd [#allocation4], 4294967040 }
  0x56   :  { %4260 = dma.done.wait [#allocation7], 896  }
  0x57   :  { %4261 = vsyncadd [#allocation7], 4294966400 }
  0x58   :  { %4262 = dma.done.wait [#allocation10], 1024  }
  0x59   :  { %4263 = vsyncadd [#allocation10], 4294966272  ;;  %v4273_v0 = vmov 0.0|0.0   ;;  %vm4274_vm0 = vmmov 0   ;;  %v4275_v1 = vmov 0.0   ;;  %vm125_vm1 = vcmask 195584  }
  0x5a   :  { %3749 = vmatprep.subr.bf16.mxu1 %v4273_v0  ;;  %3456 = vmatprep.mubr.msk.f32.mxu1 %vm4274_vm0, %v4275_v1  ;;  %v115_v2 = vld [vmem:[#allocation6] sm:$0xff]  ;;  %v116_v3 = vld [vmem:[#allocation6 + $0x8] sm:$0xff]  ;;  %v113_v7 = vld [vmem:[#allocation3] sm:$0xff]  ;;  %s4276_s18 = smov 64   ;;  %vm1055_vm2 = vcmask 254976   ;;  %vm211_vm3 = vcmask 261120  }
  0x5b   :  { %v207_v4 = vld [vmem:[%s4936_s3] sm:$0xff]  ;;  %v3745_v5 = vpack.c.bf16 %v116_v3, %v115_v2  ;;  %v208_v6 = vld [vmem:[%s4936_s3 + $0x8] sm:$0xff]  ;;  %v117_v9 = vld [vmem:[#allocation6 + $0x10] sm:$0xff]  ;;  %3445 = vmatprep.mubr.msk.f32.mxu0 %vm125_vm1, %v113_v7  ;;  %vm1060_vm4 = vcmask 257026   ;;  %vm1070_vm5 = vcmask 261126   ;;  %vm1065_vm6 = vcmask 259076  }
  0x5c   :  { %v4449_v8 = vpack.c.bf16 %v208_v6, %v207_v4  ;;  %v209_v10 = vld [vmem:[%s4936_s3 + $0x10] sm:$0xff]  ;;  %v210_v11 = vld [vmem:[%s4936_s3 + $0x18] sm:$0xff]  ;;  %v3225_v14 = vld [vmem:[%s4937_s4] ss:$0 sm:$0xff]  ;;  %s4277_s4 = smov 32   ;;  %s4280_s3 = smov [#allocation12]  }
  0x5d   :  { %3746 = vmatprep.subr.bf16.mxu0 %v3745_v5  ;;  %v4459_v12 = vpack.c.bf16 %v210_v11, %v209_v10  ;;  %v114_v13 = vld [vmem:[#allocation3 + $0x8] sm:$0xff]  ;;  %s3214_s0 = sshll.u32 %s4280_s3, 4  ;;  %vm3206_vm15 = vcmask 58368   ;;  %s3215_s0 = int_to_ptr.vmem [resolvable:$true] %s3214_s0 }
  0x5e   :  { %3748 = vmatpush3.bf16.msra.mxu0 %v3745_v5  ;;  %3751 = vmatpush3.bf16.msra.mxu1 %v4449_v8  ;;  %p4241_p13 = scmp.lt.s32.totalorder %s3215_s0, %s3215_s0 }
  0x5f   :  { %3443 = vmatprep.subr.mxu0 %v117_v9  ;;  %3752 = vmatprep.subr.bf16.mxu1 %v4273_v0 }
  0x62   :  { %3444 = vmatpush3.msra.mxu0 %v117_v9  ;;  %3754 = vmatpush3.bf16.msra.mxu1 %v4459_v12 }
  0x63   :  { %3446 = vmatmul.mubr.msk.f32.vlgmr.msra.gmra.mrb[0].mxu0 %vm125_vm1, %v114_v13  ;;  %3755 = vmatprep.subr.bf16.mxu0 %v4273_v0 }
  0x64   :  { %3757 = vmatpush3.bf16.msra.mxu0 %v4449_v8  ;;  %3467 = vmatprep.mubr.msk.f32.mxu0 %vm4274_vm0, %v4275_v1 }
  0x65   :  { %3457 = vmatmul.mubr.f32.vlgmr.msra.gmra.mrb[0].mxu1 %v4275_v1  ;;  %3758 = vmatprep.subr.bf16.mxu0 %v4273_v0 }
  0x66   :  { %3761 = vmatprep.subr.bf16.mxu1 %v4273_v0  ;;  %3478 = vmatprep.mubr.msk.f32.mxu1 %vm4274_vm0, %v4275_v1 }
  0x67   :  { %3763 = vmatpush3.bf16.msra.mxu1 %v4449_v8 }
  0x68   :  { %3760 = vmatpush3.bf16.msra.mxu0 %v4459_v12  ;;  %3764 = vmatprep.subr.bf16.mxu1 %v4273_v0 }
  0x69   :  { %3767 = vmatprep.subr.bf16.mxu0 %v4273_v0 }
  0x6b   :  { %3766 = vmatpush3.bf16.msra.mxu1 %v4459_v12 }
  0x6c   :  { %3773 = vmatprep.subr.bf16.mxu1 %v4273_v0 }
 0x136   :  { %v3447_v15 = vpop.f32.mrb[0].mxu0 }
 0x137   :  { %v4482_v16 = vadd.f32 %v3447_v15, %v3225_v14  ;;  %v198_v17 = vpop.f32.mrb[1].mxu0 }
 0x138   :  { %v4484_v18 = vadd.f32 %v3225_v14, %v198_v17  ;;  %v281_v19 = vpop.f32.mrb[0].mxu1 }
 0x139   :  { %v3458_v20 = vpop.f32.mrb[1].mxu1 }
 0x13a   :  { %v285_v21 = vadd.f32 %v281_v19, %v4484_v18 }
 0x13c   :  { %3932 = vtanh.f32 %v285_v21  ;;  %v3228_v23 = vmul.f32 -1.442695, %v285_v21 }
 0x13e   :  { %3934 = vpow2.f32 %v3228_v23 }
 0x146   :  { %v3933_v22 = vpop.eup %3932 }
 0x147   :  { %295 = vrot.lane.b32.xlu0 %v3933_v22, %s4276_s18 }
 0x148   :  { %v3935_v24 = vpop.eup %3934 }
 0x149   :  { %v289_v25 = vadd.f32 1.0, %v3935_v24 }
 0x14b   :  { %3936 = vrcp.f32 %v289_v25 }
 0x155   :  { %v3937_v26 = vpop.eup %3936 }
 0x156   :  { %v293_v29 = vmul.f32 0.0, %v3937_v26 }
 0x1b9   :  { %v296_v27 = vpop.permute.xlu0 %295 }
 0x1ba   :  { %v298_v28 = vmul.f32 %v3937_v26, %v296_v27 }
 0x1bc   :  { %300 = vrot.lane.b32.xlu0 %v298_v28, %s4277_s4 }
 0x22e   :  { %v301_v30 = vpop.permute.xlu0 %300 }
 0x22f   :  { %v303_v31 = vadd.f32 %v301_v30, %v293_v29 }
 0x231   :  { %3938 = vtanh.f32 %v303_v31  ;;  %v397_v47 = vrot.slane %v303_v31, 6 }
 0x23b   :  { %v3939_v32 = vpop.eup %3938 }
 0x23c   :  { %306 = vrot.lane.b32.xlu1 %v3939_v32, %s4276_s18 }
 0x2ae   :  { %v307_v33 = vpop.permute.xlu1 %306 }
 0x2af   :  { %v309_v34 = vmul.f32 %v3937_v26, %v307_v33 }
 0x2b1   :  { %311 = vrot.lane.b32.xlu1 %v309_v34, %s4277_s4 }
 0x323   :  { %v312_v35 = vpop.permute.xlu1 %311 }
 0x324   :  { %1056 = vst.msk [vmem:[#allocation2] sm:$0x3] %vm1055_vm2, %v312_v35  ;;  %3468 = vmatmul.mubr.msk.f32.vlgmr.msra.gmra.mrb[2].mxu0 %vm211_vm3, %v312_v35 }
 0x325   :  { %3769 = vmatpush3.bf16.msra.mxu0 %v4449_v8  ;;  %3489 = vmatprep.mubr.msk.f32.mxu0 %vm4274_vm0, %v4275_v1 }
 0x326   :  { %3770 = vmatprep.subr.bf16.mxu0 %v4273_v0 }
 0x329   :  { %3772 = vmatpush3.bf16.msra.mxu0 %v4459_v12 }
 0x32a   :  { %3779 = vmatprep.subr.bf16.mxu0 %v4273_v0 }
 0x3f7   :  { %v381_v36 = vpop.f32.mrb[2].mxu0 }
 0x3f8   :  { %v386_v37 = vrot.slane %v381_v36, 6  ;;  %v3469_v38 = vpop.f32.mrb[3].mxu0 }
 0x3fa   :  { %v388_v39 = vadd.f32 %v386_v37, %v4484_v18 }
 0x3fc   :  { %3940 = vtanh.f32 %v388_v39  ;;  %v3230_v41 = vmul.f32 -1.442695, %v388_v39 }
 0x3fe   :  { %3942 = vpow2.f32 %v3230_v41 }
 0x406   :  { %v3941_v40 = vpop.eup %3940 }
 0x407   :  { %401 = vrot.lane.b32.xlu0 %v3941_v40, %s4276_s18 }
 0x408   :  { %v3943_v42 = vpop.eup %3942 }
 0x409   :  { %v392_v43 = vadd.f32 1.0, %v3943_v42 }
 0x40b   :  { %3944 = vrcp.f32 %v392_v43 }
 0x415   :  { %v3945_v44 = vpop.eup %3944 }
 0x416   :  { %v399_v48 = vmul.f32 %v3945_v44, %v397_v47 }
 0x479   :  { %v402_v45 = vpop.permute.xlu0 %401 }
 0x47a   :  { %v404_v46 = vmul.f32 %v3945_v44, %v402_v45 }
 0x47c   :  { %406 = vrot.lane.b32.xlu1 %v404_v46, %s4277_s4 }
 0x4ee   :  { %v407_v49 = vpop.permute.xlu1 %406 }
 0x4ef   :  { %v409_v50 = vadd.f32 %v407_v49, %v399_v48 }
 0x4f1   :  { %3946 = vtanh.f32 %v409_v50  ;;  %v504_v5 = vrot.slane %v409_v50, 6 }
 0x4fb   :  { %v3947_v51 = vpop.eup %3946 }
 0x4fc   :  { %412 = vrot.lane.b32.xlu0 %v3947_v51, %s4276_s18 }
 0x56e   :  { %v413_v52 = vpop.permute.xlu0 %412 }
 0x56f   :  { %v4503_v53 = vmul.f32 %v3945_v44, %v413_v52 }
 0x571   :  { %v417_v54 = vrot.slane %v4503_v53, 2 }
 0x573   :  { %418 = vrot.lane.b32.xlu1 %v417_v54, %s4277_s4 }
 0x5e5   :  { %v419_v55 = vpop.permute.xlu1 %418 }
 0x5e6   :  { %3479 = vmatmul.mubr.msk.f32.vlgmr.msra.gmra.mrb[2].mxu1 %vm211_vm3, %v419_v55 }
 0x5e7   :  { %3775 = vmatpush3.bf16.msra.mxu1 %v4449_v8  ;;  %3500 = vmatprep.mubr.msk.f32.mxu1 %vm4274_vm0, %v4275_v1 }
 0x5e8   :  { %3776 = vmatprep.subr.bf16.mxu1 %v4273_v0 }
 0x5eb   :  { %3778 = vmatpush3.bf16.msra.mxu1 %v4459_v12 }
 0x5ec   :  { %3785 = vmatprep.subr.bf16.mxu1 %v4273_v0 }
 0x6b9   :  { %v488_v56 = vpop.f32.mrb[2].mxu1 }
 0x6ba   :  { %v493_v57 = vrot.slane %v488_v56, 4  ;;  %v3480_v58 = vpop.f32.mrb[3].mxu1 }
 0x6bc   :  { %v495_v59 = vadd.f32 %v493_v57, %v4484_v18 }
 0x6be   :  { %3948 = vtanh.f32 %v495_v59  ;;  %v3232_v61 = vmul.f32 -1.442695, %v495_v59 }
 0x6c0   :  { %3950 = vpow2.f32 %v3232_v61 }
 0x6c8   :  { %v3949_v60 = vpop.eup %3948 }
 0x6c9   :  { %508 = vrot.lane.b32.xlu0 %v3949_v60, %s4276_s18 }
 0x6ca   :  { %v3951_v62 = vpop.eup %3950 }
 0x6cb   :  { %v499_v63 = vadd.f32 1.0, %v3951_v62 }
 0x6cd   :  { %3952 = vrcp.f32 %v499_v63 }
 0x6d7   :  { %v3953_v2 = vpop.eup %3952 }
 0x6d8   :  { %v506_v6 = vmul.f32 %v3953_v2, %v504_v5 }
 0x73b   :  { %v509_v3 = vpop.permute.xlu0 %508 }
 0x73c   :  { %v511_v4 = vmul.f32 %v3953_v2, %v509_v3 }
 0x73e   :  { %513 = vrot.lane.b32.xlu1 %v511_v4, %s4277_s4 }
 0x7b0   :  { %v514_v7 = vpop.permute.xlu1 %513 }
 0x7b1   :  { %v516_v9 = vadd.f32 %v514_v7, %v506_v6 }
 0x7b3   :  { %3954 = vtanh.f32 %v516_v9  ;;  %v611_v29 = vrot.slane %v516_v9, 6 }
 0x7bd   :  { %v3955_v10 = vpop.eup %3954 }
 0x7be   :  { %519 = vrot.lane.b32.xlu0 %v3955_v10, %s4276_s18 }
 0x830   :  { %v520_v11 = vpop.permute.xlu0 %519 }
 0x831   :  { %v4518_v13 = vmul.f32 %v3953_v2, %v520_v11 }
 0x833   :  { %v524_v14 = vrot.slane %v4518_v13, 4 }
 0x835   :  { %525 = vrot.lane.b32.xlu1 %v524_v14, %s4277_s4 }
 0x8a7   :  { %v526_v15 = vpop.permute.xlu1 %525 }
 0x8a8   :  { %3490 = vmatmul.mubr.msk.f32.vlgmr.msra.gmra.mrb[4].mxu0 %vm211_vm3, %v526_v15 }
 0x8a9   :  { %3781 = vmatpush3.bf16.msra.mxu0 %v4449_v8  ;;  %3511 = vmatprep.mubr.msk.f32.mxu0 %vm4274_vm0, %v4275_v1 }
 0x8aa   :  { %3782 = vmatprep.subr.bf16.mxu0 %v4273_v0 }
 0x8ad   :  { %3784 = vmatpush3.bf16.msra.mxu0 %v4459_v12 }
 0x8ae   :  { %3791 = vmatprep.subr.bf16.mxu0 %v4273_v0 }
 0x97b   :  { %v595_v17 = vpop.f32.mrb[4].mxu0 }
 0x97c   :  { %v600_v19 = vrot.slane %v595_v17, 2  ;;  %v3491_v20 = vpop.f32.mrb[5].mxu0 }
 0x97e   :  { %v602_v21 = vadd.f32 %v600_v19, %v4484_v18 }
 0x980   :  { %3956 = vtanh.f32 %v602_v21  ;;  %v3234_v23 = vmul.f32 -1.442695, %v602_v21 }
 0x982   :  { %3958 = vpow2.f32 %v3234_v23 }
 0x98a   :  { %v3957_v22 = vpop.eup %3956 }
 0x98b   :  { %615 = vrot.lane.b32.xlu0 %v3957_v22, %s4276_s18 }
 0x98c   :  { %v3959_v24 = vpop.eup %3958 }
 0x98d   :  { %v606_v25 = vadd.f32 1.0, %v3959_v24 }
 0x98f   :  { %3960 = vrcp.f32 %v606_v25 }
 0x999   :  { %v3961_v26 = vpop.eup %3960 }
 0x99a   :  { %v613_v30 = vmul.f32 %v3961_v26, %v611_v29 }
 0x9fd   :  { %v616_v27 = vpop.permute.xlu0 %615 }
 0x9fe   :  { %v618_v28 = vmul.f32 %v3961_v26, %v616_v27 }
 0xa00   :  { %620 = vrot.lane.b32.xlu1 %v618_v28, %s4277_s4 }
 0xa72   :  { %v621_v31 = vpop.permute.xlu1 %620 }
 0xa73   :  { %v623_v32 = vadd.f32 %v621_v31, %v613_v30 }
 0xa75   :  { %3962 = vtanh.f32 %v623_v32  ;;  %v715_v47 = vrot.slane %v623_v32, 6 }
 0xa7f   :  { %v3963_v18 = vpop.eup %3962 }
 0xa80   :  { %626 = vrot.lane.b32.xlu0 %v3963_v18, %s4276_s18 }
 0xaf2   :  { %v627_v33 = vpop.permute.xlu0 %626 }
 0xaf3   :  { %v4533_v34 = vmul.f32 %v3961_v26, %v627_v33 }
 0xaf5   :  { %v631_v35 = vrot.slane %v4533_v34, 6 }
 0xaf7   :  { %632 = vrot.lane.b32.xlu1 %v631_v35, %s4277_s4 }
 0xb69   :  { %v633_v36 = vpop.permute.xlu1 %632 }
 0xb6a   :  { %3501 = vmatmul.mubr.msk.f32.vlgmr.msra.gmra.mrb[4].mxu1 %vm211_vm3, %v633_v36 }
 0xb6b   :  { %3787 = vmatpush3.bf16.msra.mxu1 %v4449_v8  ;;  %3522 = vmatprep.mubr.msk.f32.mxu1 %vm4274_vm0, %v4275_v1 }
 0xb6c   :  { %3788 = vmatprep.subr.bf16.mxu1 %v4273_v0 }
 0xb6f   :  { %3790 = vmatpush3.bf16.msra.mxu1 %v4459_v12 }
 0xc3d   :  { %v702_v37 = vpop.f32.mrb[4].mxu1 }
 0xc3e   :  { %v706_v38 = vadd.f32 %v702_v37, %v4482_v16  ;;  %v3502_v39 = vpop.f32.mrb[5].mxu1 }
 0xc40   :  { %3964 = vtanh.f32 %v706_v38  ;;  %v3236_v41 = vmul.f32 -1.442695, %v706_v38 }
 0xc42   :  { %3966 = vpow2.f32 %v3236_v41 }
 0xc4a   :  { %v3965_v40 = vpop.eup %3964 }
 0xc4b   :  { %719 = vrot.lane.b32.xlu0 %v3965_v40, %s4276_s18 }
 0xc4c   :  { %v3967_v42 = vpop.eup %3966 }
 0xc4d   :  { %v710_v43 = vadd.f32 1.0, %v3967_v42 }
 0xc4f   :  { %3968 = vrcp.f32 %v710_v43 }
 0xc59   :  { %v3969_v44 = vpop.eup %3968 }
 0xc5a   :  { %v717_v48 = vmul.f32 %v3969_v44, %v715_v47 }
 0xcbd   :  { %v720_v45 = vpop.permute.xlu0 %719 }
 0xcbe   :  { %v722_v46 = vmul.f32 %v3969_v44, %v720_v45 }
 0xcc0   :  { %724 = vrot.lane.b32.xlu1 %v722_v46, %s4277_s4 }
 0xd32   :  { %v725_v49 = vpop.permute.xlu1 %724 }
 0xd33   :  { %v727_v50 = vadd.f32 %v725_v49, %v717_v48 }
 0xd35   :  { %3970 = vtanh.f32 %v727_v50 }
 0xd3f   :  { %v3971_v51 = vpop.eup %3970 }
 0xd40   :  { %730 = vrot.lane.b32.xlu0 %v3971_v51, %s4276_s18 }
 0xdb2   :  { %v731_v52 = vpop.permute.xlu0 %730 }
 0xdb3   :  { %v733_v54 = vmul.f32 %v3969_v44, %v731_v52 }
 0xdb5   :  { %735 = vrot.lane.b32.xlu1 %v733_v54, %s4277_s4 }
 0xe27   :  { %v736_v55 = vpop.permute.xlu1 %735 }
 0xe28   :  { %1073 = vst.msk [vmem:[#allocation2 + $0x8] sm:$0x3] %vm1055_vm2, %v736_v55  ;;  %3512 = vmatmul.mubr.msk.f32.vlgmr.msra.gmra.mrb[6].mxu0 %vm211_vm3, %v736_v55  ;;  %v1090_v55 = vld [vmem:[#allocation8 + $0x8] sm:$0xff] }
 0xe29   :  { %3793 = vmatpush3.bf16.msra.mxu0 %v4449_v8  ;;  %3533 = vmatprep.mubr.msk.f32.mxu0 %vm4274_vm0, %v4275_v1 }
 0xe2a   :  { %3794 = vmatprep.subr.bf16.mxu0 %v4273_v0 }
 0xe2d   :  { %3796 = vmatpush3.bf16.msra.mxu0 %v4459_v12  ;;  %v821_v12 = vrot.slane %v727_v50, 6 }
 0xe2e   :  { %3805 = vmatprep.subr.bf16.mxu0 %v4273_v0 }
 0xefb   :  { %v805_v56 = vpop.f32.mrb[6].mxu0 }
 0xefc   :  { %v810_v57 = vrot.slane %v805_v56, 6  ;;  %v3513_v58 = vpop.f32.mrb[7].mxu0 }
 0xefd   :  { %v1182_v58 = vld [vmem:[%s4939_s6 + $0x8] sm:$0xff] }
 0xefe   :  { %v812_v59 = vadd.f32 %v810_v57, %v4482_v16  ;;  %v1181_v57 = vld [vmem:[%s4939_s6] sm:$0xff] }
 0xf00   :  { %3972 = vtanh.f32 %v812_v59  ;;  %v3238_v61 = vmul.f32 -1.442695, %v812_v59  ;;  %v1091_v59 = vld [vmem:[#allocation8 + $0x10] sm:$0xff] }
 0xf02   :  { %3974 = vpow2.f32 %v3238_v61  ;;  %v1183_v61 = vld [vmem:[%s4939_s6 + $0x10] sm:$0xff] }
 0xf0a   :  { %v3973_v60 = vpop.eup %3972 }
 0xf0b   :  { %825 = vrot.lane.b32.xlu0 %v3973_v60, %s4276_s18  ;;  %v4595_v60 = vpack.c.bf16 %v1182_v58, %v1181_v57 }
 0xf0c   :  { %v3975_v8 = vpop.eup %3974 }
 0xf0d   :  { %v816_v62 = vadd.f32 1.0, %v3975_v8  ;;  %v1184_v8 = vld [vmem:[%s4939_s6 + $0x18] sm:$0xff] }
 0xf0f   :  { %3976 = vrcp.f32 %v816_v62 }
 0xf19   :  { %v3977_v63 = vpop.eup %3976 }
 0xf1a   :  { %v823_v4 = vmul.f32 %v3977_v63, %v821_v12 }
 0xf7d   :  { %v826_v2 = vpop.permute.xlu0 %825 }
 0xf7e   :  { %v828_v3 = vmul.f32 %v3977_v63, %v826_v2 }
 0xf80   :  { %830 = vrot.lane.b32.xlu1 %v828_v3, %s4277_s4 }
 0xff2   :  { %v831_v5 = vpop.permute.xlu1 %830 }
 0xff3   :  { %v833_v6 = vadd.f32 %v831_v5, %v823_v4 }
 0xff5   :  { %3978 = vtanh.f32 %v833_v6  ;;  %v928_v28 = vrot.slane %v833_v6, 6 }
 0xfff   :  { %v3979_v7 = vpop.eup %3978 }
0x1000   :  { %836 = vrot.lane.b32.xlu0 %v3979_v7, %s4276_s18 }
0x1072   :  { %v837_v9 = vpop.permute.xlu0 %836 }
0x1073   :  { %v4560_v10 = vmul.f32 %v3977_v63, %v837_v9  ;;  %v4604_v63 = vpack.c.bf16 %v1184_v8, %v1183_v61 }
0x1075   :  { %v841_v11 = vrot.slane %v4560_v10, 2 }
0x1077   :  { %842 = vrot.lane.b32.xlu1 %v841_v11, %s4277_s4  ;;  %v3243_v11 = vld [vmem:[%s4940_s7] ss:$0 sm:$0xff] }
0x10e9   :  { %v843_v14 = vpop.permute.xlu1 %842 }
0x10ea   :  { %3523 = vmatmul.mubr.msk.f32.vlgmr.msra.gmra.mrb[6].mxu1 %vm211_vm3, %v843_v14 }
0x11bd   :  { %v912_v15 = vpop.f32.mrb[6].mxu1 }
0x11be   :  { %v917_v17 = vrot.slane %v912_v15, 4  ;;  %v3524_v19 = vpop.f32.mrb[7].mxu1 }
0x11c0   :  { %v919_v20 = vadd.f32 %v917_v17, %v4482_v16 }
0x11c2   :  { %3980 = vtanh.f32 %v919_v20  ;;  %v3240_v22 = vmul.f32 -1.442695, %v919_v20 }
0x11c4   :  { %3982 = vpow2.f32 %v3240_v22 }
0x11cc   :  { %v3981_v21 = vpop.eup %3980 }
0x11cd   :  { %932 = vrot.lane.b32.xlu0 %v3981_v21, %s4276_s18 }
0x11ce   :  { %v3983_v23 = vpop.eup %3982 }
0x11cf   :  { %v923_v24 = vadd.f32 1.0, %v3983_v23 }
0x11d1   :  { %3984 = vrcp.f32 %v923_v24 }
0x11db   :  { %v3985_v25 = vpop.eup %3984 }
0x11dc   :  { %v930_v29 = vmul.f32 %v3985_v25, %v928_v28 }
0x123f   :  { %v933_v26 = vpop.permute.xlu0 %932 }
0x1240   :  { %v935_v27 = vmul.f32 %v3985_v25, %v933_v26 }
0x1242   :  { %937 = vrot.lane.b32.xlu1 %v935_v27, %s4277_s4 }
0x12b4   :  { %v938_v30 = vpop.permute.xlu1 %937 }
0x12b5   :  { %v940_v31 = vadd.f32 %v938_v30, %v930_v29 }
0x12b7   :  { %3986 = vtanh.f32 %v940_v31 }
0x12c1   :  { %v3987_v32 = vpop.eup %3986 }
0x12c2   :  { %943 = vrot.lane.b32.xlu0 %v3987_v32, %s4276_s18 }
0x1334   :  { %v944_v18 = vpop.permute.xlu0 %943 }
0x1335   :  { %v946_v33 = vmul.f32 %v3985_v25, %v944_v18 }
0x1337   :  { %v948_v35 = vrot.slane %v946_v33, 4 }
0x1339   :  { %949 = vrot.lane.b32.xlu1 %v948_v35, %s4277_s4 }
0x13ab   :  { %v950_v36 = vpop.permute.xlu1 %949 }
0x13ac   :  { %3534 = vmatmul.mubr.msk.f32.vlgmr.msra.gmra.mrb[8].mxu0 %vm211_vm3, %v950_v36 }
0x13ad   :  { %3555 = vmatprep.mubr.msk.f32.mxu0 %vm4274_vm0, %v4275_v1  ;;  %3807 = vmatpush3.bf16.msra.mxu0 %v4595_v60 }
0x13ae   :  { %3808 = vmatprep.subr.bf16.mxu0 %v4273_v0 }
0x13b1   :  { %3810 = vmatpush3.bf16.msra.mxu0 %v4604_v63 }
0x13b2   :  { %3817 = vmatprep.subr.bf16.mxu0 %v4273_v0 }
0x13b4   :  { %3556 = vmatmul.mubr.f32.vlgmr.msra.gmra.mrb[10].mxu0 %v4275_v1 }
0x13b5   :  { %3819 = vmatpush3.bf16.msra.mxu0 %v4595_v60  ;;  %3577 = vmatprep.mubr.msk.f32.mxu0 %vm4274_vm0, %v4275_v1 }
0x13b6   :  { %3820 = vmatprep.subr.bf16.mxu0 %v4273_v0 }
0x13b9   :  { %3822 = vmatpush3.bf16.msra.mxu0 %v4604_v63 }
0x13ba   :  { %3829 = vmatprep.subr.bf16.mxu0 %v4273_v0 }
0x147f   :  { %v1019_v37 = vpop.f32.mrb[8].mxu0 }
0x1480   :  { %v1024_v38 = vrot.slane %v1019_v37, 2  ;;  %v3535_v39 = vpop.f32.mrb[9].mxu0 }
0x1482   :  { %v1026_v40 = vadd.f32 %v1024_v38, %v4482_v16  ;;  %v1035_v16 = vrot.slane %v940_v31, 6 }
0x1484   :  { %3988 = vtanh.f32 %v1026_v40  ;;  %v3242_v42 = vmul.f32 -1.442695, %v1026_v40 }
0x1486   :  { %3990 = vpow2.f32 %v3242_v42 }
0x1487   :  { %v1251_v9 = vpop.f32.mrb[10].mxu0 }
0x148e   :  { %v3989_v41 = vpop.eup %3988 }
0x148f   :  { %1039 = vrot.lane.b32.xlu0 %v3989_v41, %s4276_s18 }
0x1490   :  { %v3991_v43 = vpop.eup %3990 }
0x1491   :  { %v1030_v44 = vadd.f32 1.0, %v3991_v43 }
0x1493   :  { %3992 = vrcp.f32 %v1030_v44 }
0x149d   :  { %v3993_v45 = vpop.eup %3992 }
0x149e   :  { %v1037_v48 = vmul.f32 %v3993_v45, %v1035_v16 }
0x1501   :  { %v1040_v46 = vpop.permute.xlu0 %1039 }
0x1502   :  { %v1042_v47 = vmul.f32 %v3993_v45, %v1040_v46 }
0x1504   :  { %1044 = vrot.lane.b32.xlu1 %v1042_v47, %s4277_s4 }
0x1508   :  { %1057 = vrot.lane.b32.xlu1 %v4503_v53, %s4277_s4 }
0x150c   :  { %1067 = vrot.lane.b32.xlu1 %v4533_v34, %s4277_s4  ;;  %v1089_v34 = vld [vmem:[#allocation8] sm:$0xff] }
0x150d   :  { %v3797_v56 = vpack.c.bf16 %v1090_v55, %v1089_v34 }
0x150f   :  { %3798 = vmatprep.subr.bf16.mxu1 %v3797_v56 }
0x1510   :  { %1078 = vrot.lane.b32.xlu1 %v946_v33, %s4277_s4  ;;  %3800 = vmatpush3.bf16.msra.mxu1 %v3797_v56 }
0x1576   :  { %v1045_v49 = vpop.permute.xlu1 %1044 }
0x1577   :  { %v1047_v50 = vadd.f32 %v1045_v49, %v1037_v48 }
0x1579   :  { %3994 = vtanh.f32 %v1047_v50 }
0x157a   :  { %v1058_v51 = vpop.permute.xlu1 %1057 }
0x157b   :  { %1061 = vst.msk [vmem:[#allocation2] sm:$0xc] %vm1060_vm4, %v1058_v51 }
0x157e   :  { %v1068_v52 = vpop.permute.xlu1 %1067 }
0x157f   :  { %1071 = vst.msk [vmem:[#allocation2] sm:$0xc0] %vm1070_vm5, %v1068_v52 }
0x1582   :  { %v1079_v53 = vpop.permute.xlu1 %1078 }
0x1583   :  { %v3995_v54 = vpop.eup %3994  ;;  %1081 = vst.msk [vmem:[#allocation2 + $0x8] sm:$0x30] %vm1065_vm6, %v1079_v53 }
0x1584   :  { %1050 = vrot.lane.b32.xlu0 %v3995_v54, %s4276_s18 }
0x1588   :  { %1062 = vrot.lane.b32.xlu0 %v4518_v13, %s4277_s4  ;;  %v1092_v13 = vld [vmem:[#allocation8 + $0x18] sm:$0xff] }
0x1589   :  { %v3801_v62 = vpack.c.bf16 %v1092_v13, %v1091_v59 }
0x158b   :  { %3802 = vmatprep.subr.bf16.mxu1 %v3801_v62 }
0x158c   :  { %1074 = vrot.lane.b32.xlu0 %v4560_v10, %s4277_s4  ;;  %3804 = vmatpush3.bf16.msra.mxu1 %v3801_v62  ;;  %v3557_v10 = vpop.f32.mrb[11].mxu0 }
0x158d   :  { %3811 = vmatprep.subr.bf16.mxu1 %v4273_v0 }
0x15f6   :  { %v1051_v2 = vpop.permute.xlu0 %1050 }
0x15f7   :  { %v1053_v3 = vmul.f32 %v3993_v45, %v1051_v2 }
0x15f9   :  { %1083 = vrot.lane.b32.xlu0 %v1053_v3, %s4277_s4 }
0x15fa   :  { %v1063_v12 = vpop.permute.xlu0 %1062 }
0x15fb   :  { %1066 = vst.msk [vmem:[#allocation2] sm:$0x30] %vm1065_vm6, %v1063_v12 }
0x15fe   :  { %v1075_v4 = vpop.permute.xlu0 %1074 }
0x15ff   :  { %1077 = vst.msk [vmem:[#allocation2 + $0x8] sm:$0xc] %vm1060_vm4, %v1075_v4 }
0x1602   :  { %v1087_v5 = vld [vmem:[#allocation2] sm:$0xff] }
0x1603   :  { %3544 = vmatprep.mubr.msk.f32.mxu1 %vm211_vm3, %v1087_v5 }
0x166b   :  { %v1084_v6 = vpop.permute.xlu0 %1083 }
0x166c   :  { %1086 = vst.msk [vmem:[#allocation2 + $0x8] sm:$0xc0] %vm1070_vm5, %v1084_v6 }
0x1673   :  { %v1088_v7 = vld [vmem:[#allocation2 + $0x8] sm:$0xff] }
0x1674   :  { %3545 = vmatmul.mubr.msk.f32.vlgmr.msra.gmra.mrb[8].mxu1 %vm211_vm3, %v1088_v7 }
0x1675   :  { %3813 = vmatpush3.bf16.msra.mxu1 %v4595_v60  ;;  %3566 = vmatprep.mubr.msk.f32.mxu1 %vm4274_vm0, %v4275_v1 }
0x1676   :  { %3814 = vmatprep.subr.bf16.mxu1 %v4273_v0 }
0x1679   :  { %3816 = vmatpush3.bf16.msra.mxu1 %v4604_v63 }
0x167a   :  { %3823 = vmatprep.subr.bf16.mxu1 %v4273_v0 }
0x1747   :  { %v3546_v14 = vpop.f32.mrb[8].mxu1 }
0x1748   :  { %v4632_v15 = vadd.f32 %v3546_v14, %v3243_v11  ;;  %v1172_v17 = vpop.f32.mrb[9].mxu1 }
0x1749   :  { %v4634_v19 = vadd.f32 %v3243_v11, %v1172_v17 }
0x174b   :  { %v1255_v20 = vadd.f32 %v1251_v9, %v4634_v19 }
0x174d   :  { %3996 = vtanh.f32 %v1255_v20  ;;  %v3246_v22 = vmul.f32 -1.442695, %v1255_v20 }
0x174f   :  { %3998 = vpow2.f32 %v3246_v22 }
0x1757   :  { %v3997_v21 = vpop.eup %3996 }
0x1758   :  { %1265 = vrot.lane.b32.xlu1 %v3997_v21, %s4276_s18 }
0x1759   :  { %v3999_v23 = vpop.eup %3998 }
0x175a   :  { %v1259_v24 = vadd.f32 1.0, %v3999_v23 }
0x175c   :  { %4000 = vrcp.f32 %v1259_v24 }
0x1766   :  { %v4001_v25 = vpop.eup %4000 }
0x1767   :  { %v1263_v28 = vmul.f32 0.0, %v4001_v25 }
0x17ca   :  { %v1266_v26 = vpop.permute.xlu1 %1265 }
0x17cb   :  { %v1268_v27 = vmul.f32 %v4001_v25, %v1266_v26 }
0x17cd   :  { %1270 = vrot.lane.b32.xlu0 %v1268_v27, %s4277_s4 }
0x183f   :  { %v1271_v29 = vpop.permute.xlu0 %1270 }
0x1840   :  { %v1273_v30 = vadd.f32 %v1271_v29, %v1263_v28 }
0x1842   :  { %4002 = vtanh.f32 %v1273_v30  ;;  %v1367_v46 = vrot.slane %v1273_v30, 6 }
0x184c   :  { %v4003_v31 = vpop.eup %4002 }
0x184d   :  { %1276 = vrot.lane.b32.xlu1 %v4003_v31, %s4276_s18 }
0x18bf   :  { %v1277_v32 = vpop.permute.xlu1 %1276 }
0x18c0   :  { %v1279_v18 = vmul.f32 %v4001_v25, %v1277_v32 }
0x18c2   :  { %1281 = vrot.lane.b32.xlu0 %v1279_v18, %s4277_s4 }
0x1934   :  { %v1282_v33 = vpop.permute.xlu0 %1281 }
0x1935   :  { %2025 = vst.msk [vmem:[#allocation2] sm:$0x3] %vm1055_vm2, %v1282_v33  ;;  %3567 = vmatmul.mubr.msk.f32.vlgmr.msra.gmra.mrb[10].mxu1 %vm211_vm3, %v1282_v33 }
0x1936   :  { %3825 = vmatpush3.bf16.msra.mxu1 %v4595_v60  ;;  %3588 = vmatprep.mubr.msk.f32.mxu1 %vm4274_vm0, %v4275_v1 }
0x1937   :  { %3826 = vmatprep.subr.bf16.mxu1 %v4273_v0 }
0x193a   :  { %3828 = vmatpush3.bf16.msra.mxu1 %v4604_v63 }
0x193b   :  { %3835 = vmatprep.subr.bf16.mxu1 %v4273_v0 }
0x1a08   :  { %v1351_v35 = vpop.f32.mrb[10].mxu1 }
0x1a09   :  { %v1356_v36 = vrot.slane %v1351_v35, 6  ;;  %v3568_v37 = vpop.f32.mrb[11].mxu1 }
0x1a0b   :  { %v1358_v38 = vadd.f32 %v1356_v36, %v4634_v19 }
0x1a0d   :  { %4004 = vtanh.f32 %v1358_v38  ;;  %v3248_v40 = vmul.f32 -1.442695, %v1358_v38 }
0x1a0f   :  { %4006 = vpow2.f32 %v3248_v40 }
0x1a17   :  { %v4005_v39 = vpop.eup %4004 }
0x1a18   :  { %1371 = vrot.lane.b32.xlu1 %v4005_v39, %s4276_s18 }
0x1a19   :  { %v4007_v41 = vpop.eup %4006 }
0x1a1a   :  { %v1362_v42 = vadd.f32 1.0, %v4007_v41 }
0x1a1c   :  { %4008 = vrcp.f32 %v1362_v42 }
0x1a26   :  { %v4009_v43 = vpop.eup %4008 }
0x1a27   :  { %v1369_v47 = vmul.f32 %v4009_v43, %v1367_v46 }
0x1a8a   :  { %v1372_v44 = vpop.permute.xlu1 %1371 }
0x1a8b   :  { %v1374_v45 = vmul.f32 %v4009_v43, %v1372_v44 }
0x1a8d   :  { %1376 = vrot.lane.b32.xlu0 %v1374_v45, %s4277_s4 }
0x1aff   :  { %v1377_v16 = vpop.permute.xlu0 %1376 }
0x1b00   :  { %v1379_v48 = vadd.f32 %v1377_v16, %v1369_v47 }
0x1b02   :  { %4010 = vtanh.f32 %v1379_v48  ;;  %v1474_v2 = vrot.slane %v1379_v48, 6 }
0x1b0c   :  { %v4011_v49 = vpop.eup %4010 }
0x1b0d   :  { %1382 = vrot.lane.b32.xlu1 %v4011_v49, %s4276_s18 }
0x1b7f   :  { %v1383_v50 = vpop.permute.xlu1 %1382 }
0x1b80   :  { %v4653_v51 = vmul.f32 %v4009_v43, %v1383_v50 }
0x1b82   :  { %v1387_v52 = vrot.slane %v4653_v51, 2 }
0x1b84   :  { %1388 = vrot.lane.b32.xlu0 %v1387_v52, %s4277_s4 }
0x1bf6   :  { %v1389_v53 = vpop.permute.xlu0 %1388 }
0x1bf7   :  { %3578 = vmatmul.mubr.msk.f32.vlgmr.msra.gmra.mrb[12].mxu0 %vm211_vm3, %v1389_v53 }
0x1bf8   :  { %3831 = vmatpush3.bf16.msra.mxu0 %v4595_v60  ;;  %3599 = vmatprep.mubr.msk.f32.mxu0 %vm4274_vm0, %v4275_v1 }
0x1bf9   :  { %3832 = vmatprep.subr.bf16.mxu0 %v4273_v0 }
0x1bfc   :  { %3834 = vmatpush3.bf16.msra.mxu0 %v4604_v63 }
0x1bfd   :  { %3841 = vmatprep.subr.bf16.mxu0 %v4273_v0 }
0x1cca   :  { %v1458_v54 = vpop.f32.mrb[12].mxu0 }
0x1ccb   :  { %v1463_v34 = vrot.slane %v1458_v54, 4  ;;  %v3579_v55 = vpop.f32.mrb[13].mxu0 }
0x1ccd   :  { %v1465_v56 = vadd.f32 %v1463_v34, %v4634_v19 }
0x1ccf   :  { %4012 = vtanh.f32 %v1465_v56  ;;  %v3250_v58 = vmul.f32 -1.442695, %v1465_v56 }
0x1cd1   :  { %4014 = vpow2.f32 %v3250_v58 }
0x1cd9   :  { %v4013_v57 = vpop.eup %4012 }
0x1cda   :  { %1478 = vrot.lane.b32.xlu1 %v4013_v57, %s4276_s18 }
0x1cdb   :  { %v4015_v59 = vpop.eup %4014 }
0x1cdc   :  { %v1469_v13 = vadd.f32 1.0, %v4015_v59 }
0x1cde   :  { %4016 = vrcp.f32 %v1469_v13 }
0x1ce8   :  { %v4017_v61 = vpop.eup %4016 }
0x1ce9   :  { %v1476_v3 = vmul.f32 %v4017_v61, %v1474_v2 }
0x1d4c   :  { %v1479_v8 = vpop.permute.xlu1 %1478 }
0x1d4d   :  { %v1481_v62 = vmul.f32 %v4017_v61, %v1479_v8 }
0x1d4f   :  { %1483 = vrot.lane.b32.xlu0 %v1481_v62, %s4277_s4 }
0x1dc1   :  { %v1484_v12 = vpop.permute.xlu0 %1483 }
0x1dc2   :  { %v1486_v4 = vadd.f32 %v1484_v12, %v1476_v3 }
0x1dc4   :  { %4018 = vtanh.f32 %v1486_v4  ;;  %v1581_v28 = vrot.slane %v1486_v4, 6 }
0x1dce   :  { %v4019_v5 = vpop.eup %4018 }
0x1dcf   :  { %1489 = vrot.lane.b32.xlu1 %v4019_v5, %s4276_s18 }
0x1e41   :  { %v1490_v6 = vpop.permute.xlu1 %1489 }
0x1e42   :  { %v4668_v7 = vmul.f32 %v4017_v61, %v1490_v6 }
0x1e44   :  { %v1494_v9 = vrot.slane %v4668_v7, 4 }
0x1e46   :  { %1495 = vrot.lane.b32.xlu0 %v1494_v9, %s4277_s4 }
0x1eb8   :  { %v1496_v10 = vpop.permute.xlu0 %1495 }
0x1eb9   :  { %3589 = vmatmul.mubr.msk.f32.vlgmr.msra.gmra.mrb[12].mxu1 %vm211_vm3, %v1496_v10 }
0x1eba   :  { %3837 = vmatpush3.bf16.msra.mxu1 %v4595_v60  ;;  %3610 = vmatprep.mubr.msk.f32.mxu1 %vm4274_vm0, %v4275_v1 }
0x1ebb   :  { %3838 = vmatprep.subr.bf16.mxu1 %v4273_v0 }
0x1ebe   :  { %3840 = vmatpush3.bf16.msra.mxu1 %v4604_v63 }
0x1ebf   :  { %3847 = vmatprep.subr.bf16.mxu1 %v4273_v0 }
0x1f8c   :  { %v1565_v11 = vpop.f32.mrb[12].mxu1 }
0x1f8d   :  { %v1570_v14 = vrot.slane %v1565_v11, 2  ;;  %v3590_v17 = vpop.f32.mrb[13].mxu1 }
0x1f8f   :  { %v1572_v20 = vadd.f32 %v1570_v14, %v4634_v19 }
0x1f91   :  { %4020 = vtanh.f32 %v1572_v20  ;;  %v3252_v22 = vmul.f32 -1.442695, %v1572_v20 }
0x1f93   :  { %4022 = vpow2.f32 %v3252_v22 }
0x1f9b   :  { %v4021_v21 = vpop.eup %4020 }
0x1f9c   :  { %1585 = vrot.lane.b32.xlu1 %v4021_v21, %s4276_s18 }
0x1f9d   :  { %v4023_v23 = vpop.eup %4022 }
0x1f9e   :  { %v1576_v24 = vadd.f32 1.0, %v4023_v23 }
0x1fa0   :  { %4024 = vrcp.f32 %v1576_v24 }
0x1faa   :  { %v4025_v25 = vpop.eup %4024 }
0x1fab   :  { %v1583_v29 = vmul.f32 %v4025_v25, %v1581_v28 }
0x200e   :  { %v1586_v26 = vpop.permute.xlu1 %1585 }
0x200f   :  { %v1588_v27 = vmul.f32 %v4025_v25, %v1586_v26 }
0x2011   :  { %1590 = vrot.lane.b32.xlu0 %v1588_v27, %s4277_s4 }
0x2083   :  { %v1591_v30 = vpop.permute.xlu0 %1590 }
0x2084   :  { %v1593_v31 = vadd.f32 %v1591_v30, %v1583_v29 }
0x2086   :  { %4026 = vtanh.f32 %v1593_v31  ;;  %v1685_v46 = vrot.slane %v1593_v31, 6 }
0x2090   :  { %v4027_v19 = vpop.eup %4026 }
0x2091   :  { %1596 = vrot.lane.b32.xlu1 %v4027_v19, %s4276_s18 }
0x2103   :  { %v1597_v32 = vpop.permute.xlu1 %1596 }
0x2104   :  { %v4683_v18 = vmul.f32 %v4025_v25, %v1597_v32 }
0x2106   :  { %v1601_v33 = vrot.slane %v4683_v18, 6 }
0x2108   :  { %1602 = vrot.lane.b32.xlu0 %v1601_v33, %s4277_s4 }
0x217a   :  { %v1603_v35 = vpop.permute.xlu0 %1602 }
0x217b   :  { %3600 = vmatmul.mubr.msk.f32.vlgmr.msra.gmra.mrb[14].mxu0 %vm211_vm3, %v1603_v35 }
0x217c   :  { %3843 = vmatpush3.bf16.msra.mxu0 %v4595_v60  ;;  %3621 = vmatprep.mubr.msk.f32.mxu0 %vm4274_vm0, %v4275_v1 }
0x217d   :  { %3844 = vmatprep.subr.bf16.mxu0 %v4273_v0 }
0x2180   :  { %3846 = vmatpush3.bf16.msra.mxu0 %v4604_v63 }
0x224e   :  { %v1672_v36 = vpop.f32.mrb[14].mxu0 }
0x224f   :  { %v1676_v37 = vadd.f32 %v1672_v36, %v4632_v15  ;;  %v3601_v38 = vpop.f32.mrb[15].mxu0 }
0x2251   :  { %4028 = vtanh.f32 %v1676_v37  ;;  %v3254_v40 = vmul.f32 -1.442695, %v1676_v37 }
0x2253   :  { %4030 = vpow2.f32 %v3254_v40 }
0x225b   :  { %v4029_v39 = vpop.eup %4028 }
0x225c   :  { %1689 = vrot.lane.b32.xlu1 %v4029_v39, %s4276_s18 }
0x225d   :  { %v4031_v41 = vpop.eup %4030 }
0x225e   :  { %v1680_v42 = vadd.f32 1.0, %v4031_v41 }
0x2260   :  { %4032 = vrcp.f32 %v1680_v42 }
0x226a   :  { %v4033_v43 = vpop.eup %4032 }
0x226b   :  { %v1687_v47 = vmul.f32 %v4033_v43, %v1685_v46 }
0x22ce   :  { %v1690_v44 = vpop.permute.xlu1 %1689 }
0x22cf   :  { %v1692_v45 = vmul.f32 %v4033_v43, %v1690_v44 }
0x22d1   :  { %1694 = vrot.lane.b32.xlu0 %v1692_v45, %s4277_s4 }
0x2343   :  { %v1695_v16 = vpop.permute.xlu0 %1694 }
0x2344   :  { %v1697_v48 = vadd.f32 %v1695_v16, %v1687_v47 }
0x2346   :  { %4034 = vtanh.f32 %v1697_v48 }
0x2350   :  { %v4035_v49 = vpop.eup %4034 }
0x2351   :  { %1700 = vrot.lane.b32.xlu1 %v4035_v49, %s4276_s18 }
0x23c3   :  { %v1701_v50 = vpop.permute.xlu1 %1700 }
0x23c4   :  { %v1703_v52 = vmul.f32 %v4033_v43, %v1701_v50 }
0x23c6   :  { %1705 = vrot.lane.b32.xlu0 %v1703_v52, %s4277_s4 }
0x2438   :  { %v1706_v53 = vpop.permute.xlu0 %1705 }
0x2439   :  { %2039 = vst.msk [vmem:[#allocation2 + $0x8] sm:$0x3] %vm1055_vm2, %v1706_v53  ;;  %3611 = vmatmul.mubr.msk.f32.vlgmr.msra.gmra.mrb[14].mxu1 %vm211_vm3, %v1706_v53 }
0x243a   :  { %3849 = vmatpush3.bf16.msra.mxu1 %v4595_v60  ;;  %3632 = vmatprep.mubr.msk.f32.mxu1 %vm4274_vm0, %v4275_v1 }
0x243b   :  { %3850 = vmatprep.subr.bf16.mxu1 %v4273_v0 }
0x243e   :  { %3852 = vmatpush3.bf16.msra.mxu1 %v4604_v63  ;;  %v1791_v63 = vrot.slane %v1697_v48, 6 }
0x243f   :  { %3861 = vmatprep.subr.bf16.mxu1 %v4273_v0 }
0x250c   :  { %v1775_v54 = vpop.f32.mrb[14].mxu1 }
0x250d   :  { %v1780_v34 = vrot.slane %v1775_v54, 6  ;;  %v3612_v55 = vpop.f32.mrb[15].mxu1 }
0x250e   :  { %v2149_v55 = vld [vmem:[#allocation11 + $0x8] sm:$0xff] }
0x250f   :  { %v1782_v56 = vadd.f32 %v1780_v34, %v4632_v15  ;;  %v2148_v34 = vld [vmem:[#allocation11] sm:$0xff] }
0x2511   :  { %4036 = vtanh.f32 %v1782_v56  ;;  %v3256_v58 = vmul.f32 -1.442695, %v1782_v56  ;;  %v2058_v56 = vld [vmem:[#allocation9 + $0x10] sm:$0xff] }
0x2513   :  { %4038 = vpow2.f32 %v3256_v58  ;;  %v2059_v58 = vld [vmem:[#allocation9 + $0x18] sm:$0xff] }
0x251b   :  { %v4037_v57 = vpop.eup %4036 }
0x251c   :  { %1795 = vrot.lane.b32.xlu1 %v4037_v57, %s4276_s18  ;;  %v4739_v57 = vpack.c.bf16 %v2149_v55, %v2148_v34 }
0x251d   :  { %v4039_v60 = vpop.eup %4038 }
0x251e   :  { %v1786_v59 = vadd.f32 1.0, %v4039_v60  ;;  %v2150_v60 = vld [vmem:[#allocation11 + $0x10] sm:$0xff] }
0x2520   :  { %4040 = vrcp.f32 %v1786_v59  ;;  %v2151_v59 = vld [vmem:[#allocation11 + $0x18] sm:$0xff] }
0x252a   :  { %v4041_v13 = vpop.eup %4040 }
0x252b   :  { %v1793_v62 = vmul.f32 %v4041_v13, %v1791_v63 }
0x258e   :  { %v1796_v61 = vpop.permute.xlu1 %1795 }
0x258f   :  { %v1798_v8 = vmul.f32 %v4041_v13, %v1796_v61 }
0x2591   :  { %1800 = vrot.lane.b32.xlu0 %v1798_v8, %s4277_s4 }
0x2603   :  { %v1801_v2 = vpop.permute.xlu0 %1800 }
0x2604   :  { %v1803_v3 = vadd.f32 %v1801_v2, %v1793_v62 }
0x2606   :  { %4042 = vtanh.f32 %v1803_v3  ;;  %v1898_v27 = vrot.slane %v1803_v3, 6 }
0x2610   :  { %v4043_v12 = vpop.eup %4042 }
0x2611   :  { %1806 = vrot.lane.b32.xlu1 %v4043_v12, %s4276_s18 }
0x2683   :  { %v1807_v4 = vpop.permute.xlu1 %1806 }
0x2684   :  { %v4710_v5 = vmul.f32 %v4041_v13, %v1807_v4  ;;  %v3857_v13 = vpack.c.bf16 %v2059_v58, %v2058_v56 }
0x2686   :  { %v1811_v6 = vrot.slane %v4710_v5, 2 }
0x2688   :  { %1812 = vrot.lane.b32.xlu0 %v1811_v6, %s4277_s4  ;;  %v3261_v6 = vld [vmem:[%s4943_s10] ss:$0 sm:$0xff] }
0x26fa   :  { %v1813_v9 = vpop.permute.xlu0 %1812 }
0x26fb   :  { %3622 = vmatmul.mubr.msk.f32.vlgmr.msra.gmra.mrb[16].mxu0 %vm211_vm3, %v1813_v9 }
0x27ce   :  { %v1882_v10 = vpop.f32.mrb[16].mxu0 }
0x27cf   :  { %v1887_v11 = vrot.slane %v1882_v10, 4  ;;  %v3623_v14 = vpop.f32.mrb[17].mxu0 }
0x27d1   :  { %v1889_v17 = vadd.f32 %v1887_v11, %v4632_v15 }
0x27d3   :  { %4044 = vtanh.f32 %v1889_v17  ;;  %v3258_v21 = vmul.f32 -1.442695, %v1889_v17 }
0x27d5   :  { %4046 = vpow2.f32 %v3258_v21 }
0x27dd   :  { %v4045_v20 = vpop.eup %4044 }
0x27de   :  { %1902 = vrot.lane.b32.xlu1 %v4045_v20, %s4276_s18 }
0x27df   :  { %v4047_v22 = vpop.eup %4046 }
0x27e0   :  { %v1893_v23 = vadd.f32 1.0, %v4047_v22 }
0x27e2   :  { %4048 = vrcp.f32 %v1893_v23 }
0x27ec   :  { %v4049_v24 = vpop.eup %4048 }
0x27ed   :  { %v1900_v28 = vmul.f32 %v4049_v24, %v1898_v27 }
0x2850   :  { %v1903_v25 = vpop.permute.xlu1 %1902 }
0x2851   :  { %v1905_v26 = vmul.f32 %v4049_v24, %v1903_v25 }
0x2853   :  { %1907 = vrot.lane.b32.xlu0 %v1905_v26, %s4277_s4 }
0x28c5   :  { %v1908_v29 = vpop.permute.xlu0 %1907 }
0x28c6   :  { %v1910_v30 = vadd.f32 %v1908_v29, %v1900_v28 }
0x28c8   :  { %4050 = vtanh.f32 %v1910_v30 }
0x28d2   :  { %v4051_v31 = vpop.eup %4050 }
0x28d3   :  { %1913 = vrot.lane.b32.xlu1 %v4051_v31, %s4276_s18 }
0x2945   :  { %v1914_v19 = vpop.permute.xlu1 %1913 }
0x2946   :  { %v1916_v32 = vmul.f32 %v4049_v24, %v1914_v19 }
0x2948   :  { %v1918_v33 = vrot.slane %v1916_v32, 4 }
0x294a   :  { %1919 = vrot.lane.b32.xlu0 %v1918_v33, %s4277_s4 }
0x29bc   :  { %v1920_v35 = vpop.permute.xlu0 %1919 }
0x29bd   :  { %3633 = vmatmul.mubr.msk.f32.vlgmr.msra.gmra.mrb[16].mxu1 %vm211_vm3, %v1920_v35 }
0x29be   :  { %3654 = vmatprep.mubr.msk.f32.mxu1 %vm4274_vm0, %v4275_v1  ;;  %3863 = vmatpush3.bf16.msra.mxu1 %v4739_v57 }
0x29bf   :  { %3864 = vmatprep.subr.bf16.mxu1 %v4273_v0 }
0x2a90   :  { %v1989_v36 = vpop.f32.mrb[16].mxu1 }
0x2a91   :  { %v1994_v37 = vrot.slane %v1989_v36, 2  ;;  %v3634_v38 = vpop.f32.mrb[17].mxu1 }
0x2a93   :  { %v1996_v39 = vadd.f32 %v1994_v37, %v4632_v15  ;;  %v2005_v15 = vrot.slane %v1910_v30, 6 }
0x2a95   :  { %4052 = vtanh.f32 %v1996_v39  ;;  %v3260_v41 = vmul.f32 -1.442695, %v1996_v39 }
0x2a97   :  { %4054 = vpow2.f32 %v3260_v41 }
0x2a9f   :  { %v4053_v40 = vpop.eup %4052 }
0x2aa0   :  { %2009 = vrot.lane.b32.xlu1 %v4053_v40, %s4276_s18 }
0x2aa1   :  { %v4055_v42 = vpop.eup %4054 }
0x2aa2   :  { %v2000_v43 = vadd.f32 1.0, %v4055_v42 }
0x2aa4   :  { %4056 = vrcp.f32 %v2000_v43 }
0x2aae   :  { %v4057_v44 = vpop.eup %4056 }
0x2aaf   :  { %v2007_v47 = vmul.f32 %v4057_v44, %v2005_v15 }
0x2b12   :  { %v2010_v45 = vpop.permute.xlu1 %2009 }
0x2b13   :  { %v2012_v46 = vmul.f32 %v4057_v44, %v2010_v45 }
0x2b15   :  { %2014 = vrot.lane.b32.xlu0 %v2012_v46, %s4277_s4 }
0x2b19   :  { %2026 = vrot.lane.b32.xlu0 %v4653_v51, %s4277_s4  ;;  %v2056_v51 = vld [vmem:[#allocation9] sm:$0xff] }
0x2b1d   :  { %2034 = vrot.lane.b32.xlu0 %v4683_v18, %s4277_s4  ;;  %v2057_v18 = vld [vmem:[#allocation9 + $0x8] sm:$0xff] }
0x2b1e   :  { %v3853_v54 = vpack.c.bf16 %v2057_v18, %v2056_v51 }
0x2b20   :  { %3854 = vmatprep.subr.bf16.mxu0 %v3853_v54 }
0x2b21   :  { %2044 = vrot.lane.b32.xlu0 %v1916_v32, %s4277_s4  ;;  %3856 = vmatpush3.bf16.msra.mxu0 %v3853_v54 }
0x2b22   :  { %3858 = vmatprep.subr.bf16.mxu0 %v3857_v13 }
0x2b25   :  { %3860 = vmatpush3.bf16.msra.mxu0 %v3857_v13 }
0x2b26   :  { %3867 = vmatprep.subr.bf16.mxu0 %v4273_v0 }
0x2b87   :  { %v2015_v16 = vpop.permute.xlu0 %2014 }
0x2b88   :  { %v2017_v48 = vadd.f32 %v2015_v16, %v2007_v47 }
0x2b8a   :  { %4058 = vtanh.f32 %v2017_v48 }
0x2b8b   :  { %v2027_v49 = vpop.permute.xlu0 %2026 }
0x2b8c   :  { %2029 = vst.msk [vmem:[#allocation2] sm:$0xc] %vm1060_vm4, %v2027_v49 }
0x2b8f   :  { %v2035_v50 = vpop.permute.xlu0 %2034 }
0x2b90   :  { %2037 = vst.msk [vmem:[#allocation2] sm:$0xc0] %vm1070_vm5, %v2035_v50 }
0x2b93   :  { %v2045_v52 = vpop.permute.xlu0 %2044 }
0x2b94   :  { %v4059_v53 = vpop.eup %4058  ;;  %2047 = vst.msk [vmem:[#allocation2 + $0x8] sm:$0x30] %vm1065_vm6, %v2045_v52 }
0x2b95   :  { %2020 = vrot.lane.b32.xlu1 %v4059_v53, %s4276_s18 }
0x2b99   :  { %2030 = vrot.lane.b32.xlu1 %v4668_v7, %s4277_s4  ;;  %v4742_v7 = vpack.c.bf16 %v2151_v59, %v2150_v60 }
0x2b9b   :  { %3866 = vmatpush3.bf16.msra.mxu1 %v4742_v7 }
0x2b9c   :  { %3873 = vmatprep.subr.bf16.mxu1 %v4273_v0 }
0x2b9d   :  { %2040 = vrot.lane.b32.xlu1 %v4710_v5, %s4277_s4 }
0x2b9e   :  { %3655 = vmatmul.mubr.f32.vlgmr.msra.gmra.mrb[18].mxu1 %v4275_v1 }
0x2b9f   :  { %3875 = vmatpush3.bf16.msra.mxu1 %v4739_v57  ;;  %3676 = vmatprep.mubr.msk.f32.mxu1 %vm4274_vm0, %v4275_v1 }
0x2ba0   :  { %3876 = vmatprep.subr.bf16.mxu1 %v4273_v0 }
0x2ba3   :  { %3878 = vmatpush3.bf16.msra.mxu1 %v4742_v7 }
0x2ba4   :  { %3885 = vmatprep.subr.bf16.mxu1 %v4273_v0 }
0x2c07   :  { %v2021_v61 = vpop.permute.xlu1 %2020 }
0x2c08   :  { %v2023_v8 = vmul.f32 %v4057_v44, %v2021_v61 }
0x2c0a   :  { %2049 = vrot.lane.b32.xlu1 %v2023_v8, %s4277_s4 }
0x2c0b   :  { %v2031_v63 = vpop.permute.xlu1 %2030 }
0x2c0c   :  { %2033 = vst.msk [vmem:[#allocation2] sm:$0x30] %vm1065_vm6, %v2031_v63 }
0x2c0f   :  { %v2041_v62 = vpop.permute.xlu1 %2040 }
0x2c10   :  { %2043 = vst.msk [vmem:[#allocation2 + $0x8] sm:$0xc] %vm1060_vm4, %v2041_v62 }
0x2c13   :  { %v2054_v2 = vld [vmem:[#allocation2] sm:$0xff] }
0x2c14   :  { %3643 = vmatprep.mubr.msk.f32.mxu0 %vm211_vm3, %v2054_v2 }
0x2c71   :  { %v2218_v4 = vpop.f32.mrb[18].mxu1 }
0x2c72   :  { %v3656_v5 = vpop.f32.mrb[19].mxu1 }
0x2c7c   :  { %v2050_v3 = vpop.permute.xlu1 %2049 }
0x2c7d   :  { %2052 = vst.msk [vmem:[#allocation2 + $0x8] sm:$0xc0] %vm1070_vm5, %v2050_v3 }
0x2c84   :  { %v2055_v12 = vld [vmem:[#allocation2 + $0x8] sm:$0xff] }
0x2c85   :  { %3644 = vmatmul.mubr.msk.f32.vlgmr.msra.gmra.mrb[18].mxu0 %vm211_vm3, %v2055_v12 }
0x2c86   :  { %3869 = vmatpush3.bf16.msra.mxu0 %v4739_v57  ;;  %3665 = vmatprep.mubr.msk.f32.mxu0 %vm4274_vm0, %v4275_v1 }
0x2c87   :  { %3870 = vmatprep.subr.bf16.mxu0 %v4273_v0 }
0x2c8a   :  { %3872 = vmatpush3.bf16.msra.mxu0 %v4742_v7 }
0x2c8b   :  { %3879 = vmatprep.subr.bf16.mxu0 %v4273_v0 }
0x2d58   :  { %v3645_v9 = vpop.f32.mrb[18].mxu0 }
0x2d59   :  { %v4770_v10 = vadd.f32 %v3645_v9, %v3261_v6  ;;  %v2139_v11 = vpop.f32.mrb[19].mxu0 }
0x2d5a   :  { %v4772_v14 = vadd.f32 %v3261_v6, %v2139_v11 }
0x2d5c   :  { %v2222_v17 = vadd.f32 %v2218_v4, %v4772_v14 }
0x2d5e   :  { %4060 = vtanh.f32 %v2222_v17  ;;  %v3264_v21 = vmul.f32 -1.442695, %v2222_v17 }
0x2d60   :  { %4062 = vpow2.f32 %v3264_v21 }
0x2d68   :  { %v4061_v20 = vpop.eup %4060 }
0x2d69   :  { %2232 = vrot.lane.b32.xlu0 %v4061_v20, %s4276_s18 }
0x2d6a   :  { %v4063_v22 = vpop.eup %4062 }
0x2d6b   :  { %v2226_v23 = vadd.f32 1.0, %v4063_v22 }
0x2d6d   :  { %4064 = vrcp.f32 %v2226_v23 }
0x2d77   :  { %v4065_v24 = vpop.eup %4064 }
0x2d78   :  { %v2230_v27 = vmul.f32 0.0, %v4065_v24 }
0x2ddb   :  { %v2233_v25 = vpop.permute.xlu0 %2232 }
0x2ddc   :  { %v2235_v26 = vmul.f32 %v4065_v24, %v2233_v25 }
0x2dde   :  { %2237 = vrot.lane.b32.xlu1 %v2235_v26, %s4277_s4 }
0x2e50   :  { %v2238_v28 = vpop.permute.xlu1 %2237 }
0x2e51   :  { %v2240_v29 = vadd.f32 %v2238_v28, %v2230_v27 }
0x2e53   :  { %4066 = vtanh.f32 %v2240_v29  ;;  %v2334_v45 = vrot.slane %v2240_v29, 6 }
0x2e5d   :  { %v4067_v30 = vpop.eup %4066 }
0x2e5e   :  { %2243 = vrot.lane.b32.xlu0 %v4067_v30, %s4276_s18 }
0x2ed0   :  { %v2244_v31 = vpop.permute.xlu0 %2243 }
0x2ed1   :  { %v4778_v19 = vmul.f32 %v4065_v24, %v2244_v31 }
0x2ed3   :  { %2248 = vrot.lane.b32.xlu1 %v4778_v19, %s4277_s4 }
0x2f45   :  { %v2249_v32 = vpop.permute.xlu1 %2248 }
0x2f46   :  { %3666 = vmatmul.mubr.msk.f32.vlgmr.msra.gmra.mrb[20].mxu0 %vm211_vm3, %v2249_v32 }
0x2f47   :  { %3881 = vmatpush3.bf16.msra.mxu0 %v4739_v57  ;;  %3687 = vmatprep.mubr.msk.f32.mxu0 %vm4274_vm0, %v4275_v1 }
0x2f48   :  { %3882 = vmatprep.subr.bf16.mxu0 %v4273_v0 }
0x2f4b   :  { %3884 = vmatpush3.bf16.msra.mxu0 %v4742_v7 }
0x2f4c   :  { %3891 = vmatprep.subr.bf16.mxu0 %v4273_v0 }
0x3019   :  { %v2318_v33 = vpop.f32.mrb[20].mxu0 }
0x301a   :  { %v2323_v35 = vrot.slane %v2318_v33, 6  ;;  %v3667_v36 = vpop.f32.mrb[21].mxu0 }
0x301c   :  { %v2325_v37 = vadd.f32 %v2323_v35, %v4772_v14 }
0x301e   :  { %4068 = vtanh.f32 %v2325_v37  ;;  %v3266_v39 = vmul.f32 -1.442695, %v2325_v37 }
0x3020   :  { %4070 = vpow2.f32 %v3266_v39 }
0x3028   :  { %v4069_v38 = vpop.eup %4068 }
0x3029   :  { %2338 = vrot.lane.b32.xlu0 %v4069_v38, %s4276_s18 }
0x302a   :  { %v4071_v40 = vpop.eup %4070 }
0x302b   :  { %v2329_v41 = vadd.f32 1.0, %v4071_v40 }
0x302d   :  { %4072 = vrcp.f32 %v2329_v41 }
0x3037   :  { %v4073_v42 = vpop.eup %4072 }
0x3038   :  { %v2336_v46 = vmul.f32 %v4073_v42, %v2334_v45 }
0x309b   :  { %v2339_v43 = vpop.permute.xlu0 %2338 }
0x309c   :  { %v2341_v44 = vmul.f32 %v4073_v42, %v2339_v43 }
0x309e   :  { %2343 = vrot.lane.b32.xlu1 %v2341_v44, %s4277_s4 }
0x3110   :  { %v2344_v15 = vpop.permute.xlu1 %2343 }
0x3111   :  { %v2346_v47 = vadd.f32 %v2344_v15, %v2336_v46 }
0x3113   :  { %4074 = vtanh.f32 %v2346_v47  ;;  %v2441_v61 = vrot.slane %v2346_v47, 6 }
0x311d   :  { %v4075_v16 = vpop.eup %4074 }
0x311e   :  { %2349 = vrot.lane.b32.xlu0 %v4075_v16, %s4276_s18 }
0x3190   :  { %v2350_v48 = vpop.permute.xlu0 %2349 }
0x3191   :  { %v2352_v49 = vmul.f32 %v4073_v42, %v2350_v48 }
0x3193   :  { %v2354_v50 = vrot.slane %v2352_v49, 2 }
0x3195   :  { %2355 = vrot.lane.b32.xlu1 %v2354_v50, %s4277_s4 }
0x3207   :  { %v4794_v52 = vpop.permute.xlu1 %2355 }
0x3208   :  { %3677 = vmatmul.mubr.msk.f32.vlgmr.msra.gmra.mrb[20].mxu1 %vm211_vm3, %v4794_v52 }
0x3209   :  { %3887 = vmatpush3.bf16.msra.mxu1 %v4739_v57  ;;  %3698 = vmatprep.mubr.msk.f32.mxu1 %vm4274_vm0, %v4275_v1 }
0x320a   :  { %3888 = vmatprep.subr.bf16.mxu1 %v4273_v0 }
0x320d   :  { %3890 = vmatpush3.bf16.msra.mxu1 %v4742_v7 }
0x320e   :  { %3897 = vmatprep.subr.bf16.mxu1 %v4273_v0 }
0x32db   :  { %v2425_v53 = vpop.f32.mrb[20].mxu1 }
0x32dc   :  { %v2430_v51 = vrot.slane %v2425_v53, 4  ;;  %v3678_v18 = vpop.f32.mrb[21].mxu1 }
0x32de   :  { %v2432_v54 = vadd.f32 %v2430_v51, %v4772_v14 }
0x32e0   :  { %4076 = vtanh.f32 %v2432_v54  ;;  %v3268_v55 = vmul.f32 -1.442695, %v2432_v54 }
0x32e2   :  { %4078 = vpow2.f32 %v3268_v55 }
0x32ea   :  { %v4077_v34 = vpop.eup %4076 }
0x32eb   :  { %2445 = vrot.lane.b32.xlu0 %v4077_v34, %s4276_s18 }
0x32ec   :  { %v4079_v56 = vpop.eup %4078 }
0x32ed   :  { %v2436_v58 = vadd.f32 1.0, %v4079_v56 }
0x32ef   :  { %4080 = vrcp.f32 %v2436_v58 }
0x32f9   :  { %v4081_v60 = vpop.eup %4080 }
0x32fa   :  { %v2443_v8 = vmul.f32 %v4081_v60, %v2441_v61 }
0x335d   :  { %v2446_v59 = vpop.permute.xlu0 %2445 }
0x335e   :  { %v2448_v13 = vmul.f32 %v4081_v60, %v2446_v59 }
0x3360   :  { %2450 = vrot.lane.b32.xlu1 %v2448_v13, %s4277_s4 }
0x33d2   :  { %v2451_v63 = vpop.permute.xlu1 %2450 }
0x33d3   :  { %v2453_v62 = vadd.f32 %v2451_v63, %v2443_v8 }
0x33d5   :  { %4082 = vtanh.f32 %v2453_v62  ;;  %v2548_v27 = vrot.slane %v2453_v62, 6 }
0x33df   :  { %v4083_v2 = vpop.eup %4082 }
0x33e0   :  { %2456 = vrot.lane.b32.xlu0 %v4083_v2, %s4276_s18 }
0x3452   :  { %v2457_v3 = vpop.permute.xlu0 %2456 }
0x3453   :  { %v2459_v12 = vmul.f32 %v4081_v60, %v2457_v3 }
0x3455   :  { %v2461_v4 = vrot.slane %v2459_v12, 4 }
0x3457   :  { %2462 = vrot.lane.b32.xlu1 %v2461_v4, %s4277_s4 }
0x34c9   :  { %v4809_v5 = vpop.permute.xlu1 %2462 }
0x34ca   :  { %3688 = vmatmul.mubr.msk.f32.vlgmr.msra.gmra.mrb[22].mxu0 %vm211_vm3, %v4809_v5 }
0x34cb   :  { %3893 = vmatpush3.bf16.msra.mxu0 %v4739_v57  ;;  %3709 = vmatprep.mubr.msk.f32.mxu0 %vm4274_vm0, %v4275_v1 }
0x34cc   :  { %3894 = vmatprep.subr.bf16.mxu0 %v4273_v0 }
0x34cf   :  { %3896 = vmatpush3.bf16.msra.mxu0 %v4742_v7 }
0x34d0   :  { %3903 = vmatprep.subr.bf16.mxu0 %v4273_v0 }
0x359d   :  { %v2532_v6 = vpop.f32.mrb[22].mxu0 }
0x359e   :  { %v2537_v9 = vrot.slane %v2532_v6, 2  ;;  %v3689_v11 = vpop.f32.mrb[23].mxu0 }
0x35a0   :  { %v2539_v17 = vadd.f32 %v2537_v9, %v4772_v14 }
0x35a2   :  { %4084 = vtanh.f32 %v2539_v17  ;;  %v3270_v21 = vmul.f32 -1.442695, %v2539_v17 }
0x35a4   :  { %4086 = vpow2.f32 %v3270_v21 }
0x35ac   :  { %v4085_v20 = vpop.eup %4084 }
0x35ad   :  { %2552 = vrot.lane.b32.xlu0 %v4085_v20, %s4276_s18 }
0x35ae   :  { %v4087_v22 = vpop.eup %4086 }
0x35af   :  { %v2543_v23 = vadd.f32 1.0, %v4087_v22 }
0x35b1   :  { %4088 = vrcp.f32 %v2543_v23 }
0x35bb   :  { %v4089_v24 = vpop.eup %4088 }
0x35bc   :  { %v2550_v28 = vmul.f32 %v4089_v24, %v2548_v27 }
0x361f   :  { %v2553_v25 = vpop.permute.xlu0 %2552 }
0x3620   :  { %v2555_v26 = vmul.f32 %v4089_v24, %v2553_v25 }
0x3622   :  { %2557 = vrot.lane.b32.xlu1 %v2555_v26, %s4277_s4 }
0x3694   :  { %v2558_v29 = vpop.permute.xlu1 %2557 }
0x3695   :  { %v2560_v30 = vadd.f32 %v2558_v29, %v2550_v28 }
0x3697   :  { %4090 = vtanh.f32 %v2560_v30  ;;  %v2652_v46 = vrot.slane %v2560_v30, 6 }
0x36a1   :  { %v4091_v14 = vpop.eup %4090 }
0x36a2   :  { %2563 = vrot.lane.b32.xlu0 %v4091_v14, %s4276_s18 }
0x3714   :  { %v2564_v31 = vpop.permute.xlu0 %2563 }
0x3715   :  { %v2566_v32 = vmul.f32 %v4089_v24, %v2564_v31 }
0x3717   :  { %v2568_v33 = vrot.slane %v2566_v32, 6 }
0x3719   :  { %2569 = vrot.lane.b32.xlu1 %v2568_v33, %s4277_s4 }
0x378b   :  { %v4824_v35 = vpop.permute.xlu1 %2569 }
0x378c   :  { %3699 = vmatmul.mubr.msk.f32.vlgmr.msra.gmra.mrb[22].mxu1 %vm211_vm3, %v4824_v35 }
0x378d   :  { %3899 = vmatpush3.bf16.msra.mxu1 %v4739_v57  ;;  %3720 = vmatprep.mubr.msk.f32.mxu1 %vm4274_vm0, %v4275_v1 }
0x378e   :  { %3900 = vmatprep.subr.bf16.mxu1 %v4273_v0 }
0x3791   :  { %3902 = vmatpush3.bf16.msra.mxu1 %v4742_v7 }
0x3792   :  { %3909 = vmatprep.subr.bf16.mxu1 %v4273_v0 }
0x385f   :  { %v2639_v36 = vpop.f32.mrb[22].mxu1 }
0x3860   :  { %v2643_v37 = vadd.f32 %v2639_v36, %v4770_v10  ;;  %v3700_v38 = vpop.f32.mrb[23].mxu1 }
0x3862   :  { %4092 = vtanh.f32 %v2643_v37  ;;  %v3272_v40 = vmul.f32 -1.442695, %v2643_v37 }
0x3864   :  { %4094 = vpow2.f32 %v3272_v40 }
0x386c   :  { %v4093_v39 = vpop.eup %4092 }
0x386d   :  { %2656 = vrot.lane.b32.xlu0 %v4093_v39, %s4276_s18 }
0x386e   :  { %v4095_v41 = vpop.eup %4094 }
0x386f   :  { %v2647_v42 = vadd.f32 1.0, %v4095_v41  ;;  %v4278_v41 = vmov 0  }
0x3870   :  { %3930 = vset.pattern.permute.xlu1 %v4278_v41  ;;  %3931 = vset.pattern.permute.xlu0 %v4278_v41 }
0x3871   :  { %4096 = vrcp.f32 %v2647_v42 }
0x387b   :  { %v4097_v43 = vpop.eup %4096 }
0x387c   :  { %v2654_v15 = vmul.f32 %v4097_v43, %v2652_v46  ;;  %v4873_v46 = vld [vmem:[%s4934_s1] sm:$0x3]  ;;  %s4279_s1 = smov 96  }
0x387d   :  { %vm3281_vm7 = vcmp.gt.f32.partialorder %v4873_v46, 1.0  ;;  %vm3285_vm8 = vcmp.gt.f32.partialorder %v4873_v46, 3.0  ;;  %vm3289_vm9 = vcmp.gt.f32.partialorder %v4873_v46, 5.0  ;;  %vm3293_vm10 = vcmp.gt.f32.partialorder %v4873_v46, 7.0 }
0x387e   :  { %vm3279_vm11 = vcmp.gt.f32.partialorder %v4873_v46, 0.0  ;;  %vm3283_vm12 = vcmp.gt.f32.partialorder %v4873_v46, 2.0  ;;  %vm3291_vm13 = vcmp.gt.f32.partialorder %v4873_v46, 6.0  ;;  %vm3287_vm14 = vcmp.gt.f32.partialorder %v4873_v46, 4.0 }
0x38df   :  { %v2657_v44 = vpop.permute.xlu0 %2656 }
0x38e0   :  { %v2659_v45 = vmul.f32 %v4097_v43, %v2657_v44 }
0x38e2   :  { %2661 = vrot.lane.b32.xlu1 %v2659_v45, %s4277_s4 }
0x3954   :  { %v2662_v47 = vpop.permute.xlu1 %2661 }
0x3955   :  { %v2664_v16 = vadd.f32 %v2662_v47, %v2654_v15 }
0x3957   :  { %4098 = vtanh.f32 %v2664_v16 }
0x3961   :  { %v4099_v48 = vpop.eup %4098 }
0x3962   :  { %2667 = vrot.lane.b32.xlu0 %v4099_v48, %s4276_s18  ;;  %v3286_v48 = vsel %vm3285_vm8, 1.0, %v4275_v1 }
0x39d4   :  { %v2668_v49 = vpop.permute.xlu0 %2667 }
0x39d5   :  { %v4838_v50 = vmul.f32 %v4097_v43, %v2668_v49  ;;  %v3290_v49 = vsel %vm3289_vm9, 1.0, %v4275_v1 }
0x39d7   :  { %2672 = vrot.lane.b32.xlu1 %v4838_v50, %s4277_s4 }
0x3a49   :  { %v2673_v53 = vpop.permute.xlu1 %2672 }
0x3a4a   :  { %3710 = vmatmul.mubr.msk.f32.vlgmr.msra.gmra.mrb[24].mxu0 %vm211_vm3, %v2673_v53  ;;  %v3294_v53 = vsel %vm3293_vm10, 1.0, %v4275_v1 }
0x3a4b   :  { %3905 = vmatpush3.bf16.msra.mxu0 %v4739_v57  ;;  %3731 = vmatprep.mubr.msk.f32.mxu0 %vm4274_vm0, %v4275_v1 }
0x3a4c   :  { %3906 = vmatprep.subr.bf16.mxu0 %v4273_v0 }
0x3a4f   :  { %3908 = vmatpush3.bf16.msra.mxu0 %v4742_v7  ;;  %v2758_v7 = vrot.slane %v2664_v16, 6  ;;  %v3282_v16 = vsel %vm3281_vm7, 1.0, %v4275_v1 }
0x3b1d   :  { %v2742_v51 = vpop.f32.mrb[24].mxu0 }
0x3b1e   :  { %v2747_v18 = vrot.slane %v2742_v51, 6  ;;  %v3711_v54 = vpop.f32.mrb[25].mxu0  ;;  %v3280_v51 = vsel %vm3279_vm11, 1.0, %v4275_v1 }
0x3b20   :  { %v2749_v34 = vadd.f32 %v2747_v18, %v4770_v10 }
0x3b22   :  { %4100 = vtanh.f32 %v2749_v34  ;;  %v3274_v56 = vmul.f32 -1.442695, %v2749_v34 }
0x3b24   :  { %4102 = vpow2.f32 %v3274_v56 }
0x3b2c   :  { %v4101_v55 = vpop.eup %4100 }
0x3b2d   :  { %2762 = vrot.lane.b32.xlu0 %v4101_v55, %s4276_s18 }
0x3b2e   :  { %v4103_v58 = vpop.eup %4102 }
0x3b2f   :  { %v2753_v57 = vadd.f32 1.0, %v4103_v58  ;;  %v3284_v58 = vsel %vm3283_vm12, 1.0, %v4275_v1 }
0x3b31   :  { %4104 = vrcp.f32 %v2753_v57 }
0x3b3b   :  { %v4105_v60 = vpop.eup %4104 }
0x3b3c   :  { %v2760_v61 = vmul.f32 %v4105_v60, %v2758_v7 }
0x3b9f   :  { %v2763_v59 = vpop.permute.xlu0 %2762 }
0x3ba0   :  { %v2765_v13 = vmul.f32 %v4105_v60, %v2763_v59  ;;  %v3292_v59 = vsel %vm3291_vm13, 1.0, %v4275_v1 }
0x3ba2   :  { %2767 = vrot.lane.b32.xlu1 %v2765_v13, %s4277_s4 }
0x3c14   :  { %v2768_v8 = vpop.permute.xlu1 %2767 }
0x3c15   :  { %v2770_v63 = vadd.f32 %v2768_v8, %v2760_v61 }
0x3c17   :  { %4106 = vtanh.f32 %v2770_v63  ;;  %v2865_v27 = vrot.slane %v2770_v63, 6 }
0x3c21   :  { %v4107_v62 = vpop.eup %4106 }
0x3c22   :  { %2773 = vrot.lane.b32.xlu0 %v4107_v62, %s4276_s18  ;;  %v3288_v62 = vsel %vm3287_vm14, 1.0, %v4275_v1 }
0x3c94   :  { %v2774_v2 = vpop.permute.xlu0 %2773 }
0x3c95   :  { %v2776_v3 = vmul.f32 %v4105_v60, %v2774_v2 }
0x3c97   :  { %v2778_v12 = vrot.slane %v2776_v3, 2 }
0x3c99   :  { %2779 = vrot.lane.b32.xlu1 %v2778_v12, %s4277_s4 }
0x3d0b   :  { %v4853_v4 = vpop.permute.xlu1 %2779 }
0x3d0c   :  { %3721 = vmatmul.mubr.msk.f32.vlgmr.msra.gmra.mrb[24].mxu1 %vm211_vm3, %v4853_v4 }
0x3d0d   :  { %3742 = vmatprep.mubr.msk.f32.mxu1 %vm4274_vm0, %v4275_v1  ;;  %v3106_v1 = vld [vmem:[%s4944_s11] sm:$0xff] }
0x3ddf   :  { %v2849_v6 = vpop.f32.mrb[24].mxu1 }
0x3de0   :  { %v2854_v9 = vrot.slane %v2849_v6, 4  ;;  %v3722_v11 = vpop.f32.mrb[25].mxu1 }
0x3de2   :  { %v2856_v17 = vadd.f32 %v2854_v9, %v4770_v10 }
0x3de4   :  { %4108 = vtanh.f32 %v2856_v17  ;;  %v3276_v21 = vmul.f32 -1.442695, %v2856_v17 }
0x3de6   :  { %4110 = vpow2.f32 %v3276_v21 }
0x3dee   :  { %v4109_v20 = vpop.eup %4108 }
0x3def   :  { %2869 = vrot.lane.b32.xlu0 %v4109_v20, %s4276_s18  ;;  %v3105_v20 = vmin.f32 %v4873_v46, 8.0 }
0x3df0   :  { %v4111_v22 = vpop.eup %4110 }
0x3df1   :  { %v2860_v23 = vadd.f32 1.0, %v4111_v22  ;;  %v3109_v22 = vld [vmem:[%s4944_s11 + $0x18] sm:$0xff] }
0x3df3   :  { %4112 = vrcp.f32 %v2860_v23 }
0x3dfd   :  { %v4113_v24 = vpop.eup %4112 }
0x3dfe   :  { %v2867_v28 = vmul.f32 %v4113_v24, %v2865_v27 }
0x3e61   :  { %v2870_v25 = vpop.permute.xlu0 %2869 }
0x3e62   :  { %v2872_v26 = vmul.f32 %v4113_v24, %v2870_v25 }
0x3e64   :  { %2874 = vrot.lane.b32.xlu1 %v2872_v26, %s4277_s4 }
0x3ed6   :  { %v2875_v29 = vpop.permute.xlu1 %2874 }
0x3ed7   :  { %v2877_v30 = vadd.f32 %v2875_v29, %v2867_v28 }
0x3ed9   :  { %4114 = vtanh.f32 %v2877_v30  ;;  %v2972_v18 = vrot.slane %v2877_v30, 6 }
0x3ee3   :  { %v4115_v14 = vpop.eup %4114 }
0x3ee4   :  { %2880 = vrot.lane.b32.xlu0 %v4115_v14, %s4276_s18 }
0x3f56   :  { %v2881_v31 = vpop.permute.xlu0 %2880 }
0x3f57   :  { %v2883_v32 = vmul.f32 %v4113_v24, %v2881_v31 }
0x3f59   :  { %v2885_v33 = vrot.slane %v2883_v32, 4 }
0x3f5b   :  { %2886 = vrot.lane.b32.xlu1 %v2885_v33, %s4277_s4  ;;  %v3198_v33 = vadd.f32 0.01, %v4873_v46 }
0x3fcd   :  { %v4864_v36 = vpop.permute.xlu1 %2886 }
0x3fce   :  { %3732 = vmatmul.mubr.msk.f32.vlgmr.msra.gmra.mrb[26].mxu0 %vm211_vm3, %v4864_v36 }
0x40a1   :  { %v2956_v37 = vpop.f32.mrb[26].mxu0 }
0x40a2   :  { %v2961_v38 = vrot.slane %v2956_v37, 2  ;;  %v3733_v39 = vpop.f32.mrb[27].mxu0 }
0x40a4   :  { %v2963_v40 = vadd.f32 %v2961_v38, %v4770_v10 }
0x40a6   :  { %4116 = vtanh.f32 %v2963_v40  ;;  %v3278_v43 = vmul.f32 -1.442695, %v2963_v40 }
0x40a8   :  { %4118 = vpow2.f32 %v3278_v43 }
0x40b0   :  { %v4117_v42 = vpop.eup %4116 }
0x40b1   :  { %2976 = vrot.lane.b32.xlu0 %v4117_v42, %s4276_s18 }
0x40b2   :  { %v4119_v44 = vpop.eup %4118 }
0x40b3   :  { %v2967_v45 = vadd.f32 1.0, %v4119_v44 }
0x40b5   :  { %4120 = vrcp.f32 %v2967_v45 }
0x40bf   :  { %v4121_v15 = vpop.eup %4120 }
0x40c0   :  { %v2974_v54 = vmul.f32 %v4121_v15, %v2972_v18 }
0x4123   :  { %v2977_v47 = vpop.permute.xlu0 %2976 }
0x4124   :  { %v2979_v10 = vmul.f32 %v4121_v15, %v2977_v47 }
0x4126   :  { %2981 = vrot.lane.b32.xlu1 %v2979_v10, %s4277_s4 }
0x412a   :  { %3006 = vperm.xlu1 %3930, %v3282_v16  }
0x412e   :  { %3036 = vperm.xlu1 %3930, %v3286_v48  }
0x4132   :  { %3061 = vperm.xlu1 %3930, %v3290_v49  }
0x4136   :  { %3091 = vperm.xlu1 %3930, %v3294_v53  }
0x413a   :  { %2996 = vperm.xlu1 %3930, %v3280_v51  }
0x4198   :  { %v2982_v34 = vpop.permute.xlu1 %2981 }
0x4199   :  { %v2984_v55 = vadd.f32 %v2982_v34, %v2974_v54 }
0x419b   :  { %4122 = vtanh.f32 %v2984_v55 }
0x419c   :  { %4124 = vrcp.f32 %v3198_v33 }
0x41a5   :  { %v4123_v56 = vpop.eup %4122 }
0x41a6   :  { %2987 = vrot.lane.b32.xlu0 %v4123_v56, %s4276_s18  ;;  %s4236_s18 = scalar_lea.vmem %s3215_s0, 32 }
0x41a7   :  { %p4237_p12 = scmp.ne.s32.totalorder %s3215_s0, %s4236_s18  ;;  %p4242_p0 = scmp.lt.s32.totalorder %s4236_s18, %s4236_s18 }
0x41a9   :  { %v3007_v57 = vpop.permute.xlu1 %3006  ;;  %p4243_p1 = por %p4242_p0, %p4241_p13 }
0x41aa   :  { %v3010_v60 = vmul.f32 %v3007_v57, %v4794_v52  ;;  %3021 = vperm.xlu0 %3931, %v3284_v58  }
0x41ab   :  { %p4244_p2 = pnand %p4243_p1, %p4237_p12 }
0x41ac   :  { %3012 = vrot.lane.b32.xlu1 %v3010_v60, %s4279_s1 }
0x41ad   :  { %v3037_v13 = vpop.permute.xlu1 %3036 }
0x41ae   :  { %v3040_v7 = vmul.f32 %v3037_v13, %v4824_v35  ;;  %3076 = vperm.xlu0 %3931, %v3292_v59  }
0x41b0   :  { %3042 = vrot.lane.b32.xlu1 %v3040_v7, %s4279_s1 }
0x41b1   :  { %v3062_v3 = vpop.permute.xlu1 %3061 }
0x41b2   :  { %v3065_v35 = vmul.f32 %v3062_v3, %v4853_v4  ;;  %v3108_v4 = vld [vmem:[%s4944_s11 + $0x10] sm:$0xff] }
0x41b3   :  { %v3913_v23 = vpack.c.bf16 %v3109_v22, %v3108_v4 }
0x41b5   :  { %v3092_v9 = vpop.permute.xlu1 %3091 }
0x41b9   :  { %v2997_v24 = vpop.permute.xlu1 %2996 }
0x41ba   :  { %v2999_v27 = vmul.f32 %v2997_v24, %v4778_v19  ;;  %v4125_v19 = vpop.eup %4124 }
0x4218   :  { %v2988_v61 = vpop.permute.xlu0 %2987 }
0x4219   :  { %v2990_v8 = vmul.f32 %v4121_v15, %v2988_v61 }
0x421b   :  { %v3095_v63 = vrot.slane %v2990_v8, 6 }
0x421d   :  { %3096 = vrot.lane.b32.xlu0 %v3095_v63, %s4277_s4 }
0x421e   :  { %v3013_v26 = vpop.permute.xlu1 %3012 }
0x421f   :  { %v3015_v29 = vadd.f32 %v3013_v26, %v2999_v27 }
0x4221   :  { %3051 = vperm.xlu0 %3931, %v3288_v62  }
0x4222   :  { %v3043_v14 = vpop.permute.xlu1 %3042 }
0x4229   :  { %v3022_v52 = vpop.permute.xlu0 %3021 }
0x422a   :  { %v3025_v2 = vmul.f32 %v3022_v52, %v4809_v5  ;;  %v3107_v5 = vld [vmem:[%s4944_s11 + $0x8] sm:$0xff] }
0x422b   :  { %v3910_v21 = vpack.c.bf16 %v3107_v5, %v3106_v1 }
0x422c   :  { %3027 = vrot.lane.b32.xlu0 %v3025_v2, %s4279_s1 }
0x422d   :  { %v3077_v12 = vpop.permute.xlu0 %3076  ;;  %3911 = vmatpush3.bf16.msra.mxu1 %v3910_v21 }
0x422e   :  { %v3080_v6 = vmul.f32 %v3077_v12, %v4864_v36  ;;  %3912 = vmatprep.subr.bf16.mxu1 %v4273_v0 }
0x4230   :  { %3067 = vrot.lane.b32.xlu0 %v3065_v35, %s4279_s1  ;;  %3082 = vrot.lane.b32.xlu1 %v3080_v6, %s4279_s1 }
0x4231   :  { %3914 = vmatpush3.bf16.msra.mxu1 %v3913_v23 }
0x428f   :  { %v3097_v11 = vpop.permute.xlu0 %3096 }
0x4290   :  { %v3099_v17 = vmul.f32 %v3097_v11, %v3092_v9 }
0x4292   :  { %3101 = vrot.lane.b32.xlu0 %v3099_v17, %s4279_s1 }
0x4296   :  { %3119 = vperm.xlu0 %3931, %v3105_v20  }
0x42a0   :  { %v3052_v25 = vpop.permute.xlu0 %3051 }
0x42a1   :  { %v3054_v32 = vmul.f32 %v3052_v25, %v4838_v50  ;;  %v3295_v50 = vld [vmem:[%s4945_s12] ss:$0 sm:$0xff] }
0x42a2   :  { %v3083_v0 = vpop.permute.xlu1 %3082 }
0x42a4   :  { %v3028_v28 = vpop.permute.xlu0 %3027 }
0x42a5   :  { %v3030_v30 = vadd.f32 %v3028_v28, %v3015_v29 }
0x42a7   :  { %v3045_v31 = vadd.f32 %v3043_v14, %v3030_v30 }
0x42a8   :  { %v3068_v37 = vpop.permute.xlu0 %3067 }
0x42a9   :  { %v3055_v36 = vadd.f32 %v3054_v32, %v3045_v31 }
0x42ab   :  { %v3070_v38 = vadd.f32 %v3068_v37, %v3055_v36 }
0x42ad   :  { %v3085_v39 = vadd.f32 %v3083_v0, %v3070_v38 }
0x4304   :  { %v3102_v40 = vpop.permute.xlu0 %3101 }
0x4305   :  { %v3104_v41 = vadd.f32 %v3102_v40, %v3085_v39 }
0x4307   :  { %3124 = vrot.lane.b32.xlu1 %v3104_v41, %s4277_s4 }
0x430b   :  { %3202 = vperm.xlu1 %3930, %v4125_v19  }
0x4315   :  { %v3120_v43 = vpop.permute.xlu0 %3119 }
0x4316   :  { %v3122_v44 = vmul.f32 %v3295_v50, %v3120_v43 }
0x4379   :  { %v3125_v42 = vpop.permute.xlu1 %3124 }
0x437a   :  { %3743 = vmatmul.mubr.msk.f32.vlgmr.msra.gmra.mrb[26].mxu1 %vm211_vm3, %v3125_v42 }
0x438a   :  { %v3203_v47 = vpop.permute.xlu1 %3202 }
0x444d   :  { %v3194_v45 = vpop.f32.mrb[26].mxu1 }
0x444e   :  { %v3195_v46 = vadd.f32 %v3194_v45, %v3122_v44  ;;  %v3744_v15 = vpop.f32.mrb[27].mxu1 }
0x4450   :  { %v3205_v10 = vmul.f32 %v3203_v47, %v3195_v46 }
0x4452   :  { %3207 = vst.msk [vmem:[#allocation12] sm:$0x3] %vm3206_vm15, %v3205_v10 }
0x4453   :  { %4247 = shalt.err (!%p4244_p2)
}
0x4454   :  { %s4248_s27 = scalar_lea.hbm %s4946_s13, 32 }
0x4455   :  { %p4249_p3 = scmp.ne.s32.totalorder %s4946_s13, %s4248_s27  ;;  %p4252_p4 = scmp.lt.u32.totalorder %s4248_s27, %s4946_s13 }
0x4457   :  { %p4254_p5 = pnand %p4252_p4, %p4249_p3 }
0x4459   :  { %4257 = shalt.err (!%p4254_p5)
}
0x445a   :  { %3217 = dma.vmem_to_hbm [thread:$0]  %s3215_s0, 32, %s4946_s13, [#allocation5]  }
0x445b   :  { %4264 = dma.done.wait [#allocation5], 32  }
0x445c   :  { %4265 = vsyncadd [#allocation5], 4294967264 }
0x445d   :  { %3221 = vsyncpa [#allocation4], 1 }
0x445e   :  { %3222 = vsyncpa [#allocation7], 1 }
0x445f   :  { %3223 = vsyncpa [#allocation10], 1 }
0x4460   :  { %3224 = vsyncpa [#allocation5], 1 }

</bundles_post_ra>
